<compile_context>
chip_gen: v7x
topology: tpu7x:2x2x1
jax: 0.10.0
libtpu: 0.0.40
codegen_flags: <defaults>
</compile_context>

<pallas_src>
import functools

import jax
import jax.numpy as jnp
from jax.experimental import pallas as pl
from jax.experimental.pallas import tpu as pltpu


LANE = 128
SUBLANE_BF16 = 16                  # bf16 packs 16 sublanes per vreg
K_COLLAPSE = 8192                  # largest K kept as a single reduction step
VMEM_LIMIT = 48 * 1024 * 1024      # safe on v7x (64 MiB phys), fine on v5e/v6e


def _round_up(x, m):
    return ((x + m - 1) // m) * m


def _k_tiles(K):
    """(TK, Kp): collapse the reduction to one step whenever it fits."""
    Kp = _round_up(K, LANE)
    if Kp <= K_COLLAPSE:
        return Kp, Kp
    TK = 2048
    return TK, _round_up(Kp, TK)


def _wn_tiles(K, Cout):
    """Weight-side tiling, shared by build_params (weight pre-padding) and the
    forward pass so the padded layouts always agree."""
    TK, Kp = _k_tiles(K)
    TN = min(512, _round_up(Cout, LANE))     # full Cout in one N tile (<=512)
    Np = _round_up(Cout, TN)
    return TK, Kp, TN, Np


def _m_tile(M, n_tiles_j):
    TM = min(512, _round_up(M, SUBLANE_BF16))
    Mp = _round_up(M, TM)
    # If the N axis collapsed to a single tile, give the M axis >= 2 "parallel"
    # tiles so the second TensorCore (v7x megacore) is not idle.
    if n_tiles_j == 1 and Mp // TM == 1 and M > SUBLANE_BF16:
        TM = _round_up((M + 1) // 2, SUBLANE_BF16)
        Mp = _round_up(M, TM)
    return TM, Mp


# ----------------------------------------------------------------------------
# Pallas kernels: fused conv-as-GEMM  ->  y = A @ W' + shift ; LeakyReLU
# (per-channel scale already folded into W' columns at build time)
# ----------------------------------------------------------------------------
def _gemm_single_k_kernel(a_ref, w_ref, shift_ref, o_ref, *,
                          apply_lrelu: bool, neg_slope: float):
    # Whole K in one step: no VMEM accumulator round-trip.
    y = jnp.dot(a_ref[...], w_ref[...], preferred_element_type=jnp.float32)
    y = y + shift_ref[...]
    if apply_lrelu:
        y = jnp.where(y >= 0, y, neg_slope * y)
    o_ref[...] = y.astype(o_ref.dtype)


def _gemm_multi_k_kernel(a_ref, w_ref, shift_ref, o_ref, acc_ref, *,
                         apply_lrelu: bool, neg_slope: float):
    k = pl.program_id(2)

    @pl.when(k == 0)
    def _():
        acc_ref[...] = jnp.zeros_like(acc_ref)

    acc_ref[...] += jnp.dot(a_ref[...], w_ref[...],
                            preferred_element_type=jnp.float32)

    @pl.when(k == pl.num_programs(2) - 1)
    def _():
        y = acc_ref[...] + shift_ref[...]          # f32 epilogue (v5e-friendly)
        if apply_lrelu:
            y = jnp.where(y >= 0, y, neg_slope * y)
        o_ref[...] = y.astype(o_ref.dtype)


def pallas_conv_gemm(a, w_p, shift_p, K, Cout, apply_lrelu, out_dtype):
    """a: (M, K) bf16 im2col patches. w_p: (Kp, Np) bf16 pre-padded weight with
    scale folded in. shift_p: (1, Np) f32. Returns (M, Cout) in out_dtype."""
    a = a.astype(jnp.bfloat16)
    M = a.shape[0]
    assert a.shape[1] == K
    TK, Kp, TN, Np = _wn_tiles(K, Cout)
    assert w_p.shape == (Kp, Np) and shift_p.shape == (1, Np)
    TM, Mp = _m_tile(M, Np // TN)

    a_p = a
    if (Mp, Kp) != a.shape:
        a_p = jnp.pad(a, ((0, Mp - M), (0, Kp - K)))

    nk = Kp // TK
    out_itemsize = jnp.dtype(out_dtype).itemsize
    cost = pl.CostEstimate(
        flops=2 * Mp * Kp * Np,
        transcendentals=0,
        bytes_accessed=(Mp * Kp * 2 * (Np // TN) + Kp * Np * 2 * (Mp // TM)
                        + Np * 4 + Mp * Np * out_itemsize))

    if nk == 1:
        kern = functools.partial(_gemm_single_k_kernel,
                                 apply_lrelu=apply_lrelu, neg_slope=0.2)
        grid = (Mp // TM, Np // TN)
        in_specs = [pl.BlockSpec((TM, TK), lambda i, j: (i, 0)),
                    pl.BlockSpec((TK, TN), lambda i, j: (0, j)),
                    pl.BlockSpec((1, TN), lambda i, j: (0, j))]
        out_specs = pl.BlockSpec((TM, TN), lambda i, j: (i, j))
        scratch = []
        dims = ("parallel", "parallel")
    else:
        kern = functools.partial(_gemm_multi_k_kernel,
                                 apply_lrelu=apply_lrelu, neg_slope=0.2)
        grid = (Mp // TM, Np // TN, nk)
        in_specs = [pl.BlockSpec((TM, TK), lambda i, j, k: (i, k)),
                    pl.BlockSpec((TK, TN), lambda i, j, k: (k, j)),
                    pl.BlockSpec((1, TN), lambda i, j, k: (0, j))]
        out_specs = pl.BlockSpec((TM, TN), lambda i, j, k: (i, j))
        scratch = [pltpu.VMEM((TM, TN), jnp.float32)]
        dims = ("parallel", "parallel", "arbitrary")

    out = pl.pallas_call(
        kern,
        out_shape=jax.ShapeDtypeStruct((Mp, Np), out_dtype),
        grid_spec=pltpu.PrefetchScalarGridSpec(
            num_scalar_prefetch=0,
            grid=grid,
            in_specs=in_specs,
            out_specs=out_specs,
            scratch_shapes=scratch),
        compiler_params=pltpu.CompilerParams(
            dimension_semantics=dims,
            vmem_limit_bytes=VMEM_LIMIT),
        cost_estimate=cost,
    )(a_p, w_p, shift_p)
    if (Mp, Np) != (M, Cout):
        out = out[:M, :Cout]
    return out


# ----------------------------------------------------------------------------
# Pallas kernels: final Cout=1 conv as a row-wise reduction (VPU mul + XLU sum)
# instead of a 128x zero-padded MXU GEMM.
# ----------------------------------------------------------------------------
def _matvec_single_k_kernel(a_ref, w_ref, shift_ref, o_ref):
    prod = a_ref[...].astype(jnp.float32) * w_ref[...].astype(jnp.float32)
    y = jnp.sum(prod, axis=-1, keepdims=True) + shift_ref[...]
    o_ref[...] = y.astype(o_ref.dtype)


def _matvec_multi_k_kernel(a_ref, w_ref, shift_ref, o_ref, acc_ref):
    k = pl.program_id(1)

    @pl.when(k == 0)
    def _():
        acc_ref[...] = jnp.zeros_like(acc_ref)

    prod = a_ref[...].astype(jnp.float32) * w_ref[...].astype(jnp.float32)
    acc_ref[...] += jnp.sum(prod, axis=-1, keepdims=True)

    @pl.when(k == pl.num_programs(1) - 1)
    def _():
        o_ref[...] = (acc_ref[...] + shift_ref[...]).astype(o_ref.dtype)


def pallas_conv_matvec(a, w_row, shift11, K, out_dtype):
    """a: (M, K) bf16; w_row: (1, Kp) bf16 (scale folded in); shift11: (1,1) f32."""
    a = a.astype(jnp.bfloat16)
    M = a.shape[0]
    assert a.shape[1] == K
    TK, Kp = _k_tiles(K)
    assert w_row.shape == (1, Kp) and shift11.shape == (1, 1)
    TM, Mp = _m_tile(M, 1)

    a_p = a
    if (Mp, Kp) != a.shape:
        a_p = jnp.pad(a, ((0, Mp - M), (0, Kp - K)))

    nk = Kp // TK
    out_itemsize = jnp.dtype(out_dtype).itemsize
    cost = pl.CostEstimate(
        flops=2 * Mp * Kp,
        transcendentals=0,
        bytes_accessed=Mp * Kp * 2 + Kp * 2 + 4 + Mp * out_itemsize)

    if nk == 1:
        kern = _matvec_single_k_kernel
        grid = (Mp // TM,)
        in_specs = [pl.BlockSpec((TM, TK), lambda i: (i, 0)),
                    pl.BlockSpec((1, TK), lambda i: (0, 0)),
                    pl.BlockSpec((1, 1), lambda i: (0, 0))]
        out_specs = pl.BlockSpec((TM, 1), lambda i: (i, 0))
        scratch = []
        dims = ("parallel",)
    else:
        kern = _matvec_multi_k_kernel
        grid = (Mp // TM, nk)
        in_specs = [pl.BlockSpec((TM, TK), lambda i, k: (i, k)),
                    pl.BlockSpec((1, TK), lambda i, k: (0, k)),
                    pl.BlockSpec((1, 1), lambda i, k: (0, 0))]
        out_specs = pl.BlockSpec((TM, 1), lambda i, k: (i, 0))
        scratch = [pltpu.VMEM((TM, 1), jnp.float32)]
        dims = ("parallel", "arbitrary")

    out = pl.pallas_call(
        kern,
        out_shape=jax.ShapeDtypeStruct((Mp, 1), out_dtype),
        grid_spec=pltpu.PrefetchScalarGridSpec(
            num_scalar_prefetch=0,
            grid=grid,
            in_specs=in_specs,
            out_specs=out_specs,
            scratch_shapes=scratch),
        compiler_params=pltpu.CompilerParams(
            dimension_semantics=dims,
            vmem_limit_bytes=VMEM_LIMIT),
        cost_estimate=cost,
    )(a_p, w_row, shift11)
    if Mp != M:
        out = out[:M]
    return out


# ----------------------------------------------------------------------------
# Glue: padding / im2col / layer plumbing (plain JAX, bf16 activations)
# ----------------------------------------------------------------------------
def _im2col(x_pad, kh, kw, stride):
    """x_pad: (N, Hp, Wp, C) -> patches (N*Ho*Wo, kh*kw*C), plus (N, Ho, Wo)."""
    N, Hp, Wp, C = x_pad.shape
    Ho = (Hp - kh) // stride + 1
    Wo = (Wp - kw) // stride + 1
    cols = []
    for i in range(kh):
        for j in range(kw):
            cols.append(x_pad[:, i:i + stride * Ho:stride,
                              j:j + stride * Wo:stride, :])
    p = jnp.stack(cols, axis=3)                  # (N, Ho, Wo, kh*kw, C)
    return p.reshape(N * Ho * Wo, kh * kw * C), (N, Ho, Wo)


def nlayer_discriminator_forward(x_nchw, layers):
    x = jnp.transpose(x_nchw, (0, 2, 3, 1)).astype(jnp.bfloat16)  # NCHW->NHWC
    n_total = len(layers)
    for li, layer in enumerate(layers):
        # Lane-align the channel dim once (weight rows zero-padded to match),
        # so K = 16*Cin is a multiple of 128 and no K pad of A is needed.
        C = x.shape[-1]
        cin_p = layer["cin_p"]
        if cin_p != C:
            x = jnp.pad(x, ((0, 0), (0, 0), (0, 0), (0, cin_p - C)))
        xp = jnp.pad(x, ((0, 0), (1, 1), (1, 1), (0, 0)))          # padding=1
        a, (n, ho, wo) = _im2col(xp, 4, 4, layer["stride"])
        last = li == n_total - 1
        out_dtype = jnp.float32 if last else jnp.bfloat16
        if layer["kind"] == "matvec":
            y = pallas_conv_matvec(a, layer["w"], layer["shift"],
                                   layer["K"], out_dtype)
        else:
            y = pallas_conv_gemm(a, layer["w"], layer["shift"], layer["K"],
                                 layer["cout"], layer["lrelu"], out_dtype)
        x = y.reshape(n, ho, wo, layer["cout"])
    return jnp.transpose(x, (0, 3, 1, 2))        # NHWC -> NCHW


# ----------------------------------------------------------------------------
# Deterministic parameter construction (matches the PyTorch __init__ topology).
# Weights are stored pre-padded / pre-cast to their tiled bf16 layouts so the
# forward path does no per-layer weight pad/convert copies.
# ----------------------------------------------------------------------------
def build_params(key, input_nc, ndf=64, n_layers=3):
    kw = 4
    eps = 1e-5
    cfg = [dict(cin=input_nc, cout=ndf, stride=2, bn=False, lrelu=True)]
    nf_mult = 1
    for n in range(1, n_layers):
        nf_prev, nf_mult = nf_mult, min(2 ** n, 8)
        cfg.append(dict(cin=ndf * nf_prev, cout=ndf * nf_mult, stride=2,
                        bn=True, lrelu=True))
    nf_prev, nf_mult = nf_mult, min(2 ** n_layers, 8)
    cfg.append(dict(cin=ndf * nf_prev, cout=ndf * nf_mult, stride=1,
                    bn=True, lrelu=True))
    # final conv: bias, no norm, no activation (use_sigmoid=False)
    cfg.append(dict(cin=ndf * nf_mult, cout=1, stride=1, bn=False, lrelu=False))

    layers = []
    for c in cfg:
        key, kw_key, kb_key, kg_key, kbt_key = jax.random.split(key, 5)
        cin, cout = c["cin"], c["cout"]
        # PyTorch conv weight layout (Cout, Cin, KH, KW)
        w_t = jax.random.normal(kw_key, (cout, cin, kw, kw), jnp.float32) * 0.02
        # -> (KH, KW, Cin, Cout); zero-pad Cin to a multiple of 8 so the
        # im2col column ordering (tap-major, channel-minor) matches and
        # K = 16*Cin_p is already lane-aligned.
        w4 = jnp.transpose(w_t, (2, 3, 1, 0))
        cin_p = _round_up(cin, 8)
        if cin_p != cin:
            w4 = jnp.pad(w4, ((0, 0), (0, 0), (0, cin_p - cin), (0, 0)))
        K = kw * kw * cin_p
        w2 = w4.reshape(K, cout)

        if c["bn"]:
            # Eval-mode BatchNorm with fresh running stats (mean=0, var=1).
            gamma = 1.0 + jax.random.normal(kg_key, (cout,), jnp.float32) * 0.02
            beta = jax.random.normal(kbt_key, (cout,), jnp.float32) * 0.02
            run_mean = jnp.zeros((cout,), jnp.float32)
            run_var = jnp.ones((cout,), jnp.float32)
            scale = gamma / jnp.sqrt(run_var + eps)
            shift = beta - run_mean * scale
        else:
            shift = jax.random.normal(kb_key, (cout,), jnp.float32) * 0.02
            scale = jnp.ones((cout,), jnp.float32)
        # Fold per-channel scale into the weight columns: y = A @ (W*s) + shift
        w2 = w2 * scale[None, :]

        layer = dict(stride=c["stride"], lrelu=c["lrelu"], cin_p=cin_p,
                     cout=cout, K=K)
        if cout == 1:
            _, Kp = _k_tiles(K)
            w_row = jnp.pad(w2[:, 0], (0, Kp - K)).reshape(1, Kp)
            layer.update(kind="matvec",
                         w=w_row.astype(jnp.bfloat16),
                         shift=shift.reshape(1, 1).astype(jnp.float32))
        else:
            _, Kp, _, Np = _wn_tiles(K, cout)
            w_p = jnp.pad(w2, ((0, Kp - K), (0, Np - cout)))
            s_p = jnp.pad(shift.reshape(1, cout), ((0, 0), (0, Np - cout)))
            layer.update(kind="gemm",
                         w=w_p.astype(jnp.bfloat16),
                         shift=s_p.astype(jnp.float32))
        layers.append(layer)
    return layers


# ----------------------------------------------------------------------------
if __name__ == "__main__":
    key = jax.random.PRNGKey(0)
    key, pkey, xkey = jax.random.split(key, 3)

    input_nc, ndf, n_layers = 4, 8, 3
    layers = build_params(pkey, input_nc=input_nc, ndf=ndf, n_layers=n_layers)

    # Input: batch=2, channels=4, spatial=32 (needs >=32 so the 4x4/stride-1
    # tail convs keep positive spatial extent). NCHW like PyTorch.
    x = jax.random.normal(xkey, (2, input_nc, 32, 32), jnp.float32)

    fwd = jax.jit(lambda inp: nlayer_discriminator_forward(inp, layers))
    out = fwd(x)
    jax.block_until_ready(out)

    # Expected PatchGAN map: (2, 1, 2, 2) for this configuration.
    assert out.shape == (2, 1, 2, 2), out.shape
    assert out.dtype == jnp.float32
    assert bool(jnp.all(jnp.isfinite(out)))
    print("KERNEL_OK")
</pallas_src>

<mosaic_0001>
module attributes {stable_mosaic.version = 11 : i64} {
  func.func @_gemm_single_k_kernel(%arg0: i32, %arg1: i32, %arg2: memref<256x128xbf16, #tpu.memory_space<vmem>>, %arg3: memref<128x128xbf16, #tpu.memory_space<vmem>>, %arg4: memref<1x128xf32, #tpu.memory_space<vmem>>, %arg5: memref<256x128xbf16, #tpu.memory_space<vmem>>) attributes {dimension_semantics = [#tpu.dimension_semantics<parallel>, #tpu.dimension_semantics<parallel>], iteration_bounds = array<i64: 2, 1>, scalar_prefetch = 0 : i64, scratch_operands = 0 : i64, tpu.core_type = #tpu.core_type<tc>, window_params = [{transform_indices = @transform_0, window_bounds = array<i64: 256, 128>}, {transform_indices = @transform_1, window_bounds = array<i64: 128, 128>}, {transform_indices = @transform_2, window_bounds = array<i64: 1, 128>}, {transform_indices = @transform_3, window_bounds = array<i64: 256, 128>}]} {
    %c0 = arith.constant 0 : index
    %c0_0 = arith.constant 0 : index
    %0 = vector.load %arg2[%c0, %c0_0] : memref<256x128xbf16, #tpu.memory_space<vmem>>, vector<256x128xbf16>
    %c0_1 = arith.constant 0 : index
    %c0_2 = arith.constant 0 : index
    %1 = vector.load %arg3[%c0_1, %c0_2] : memref<128x128xbf16, #tpu.memory_space<vmem>>, vector<128x128xbf16>
    %cst = arith.constant dense<0.000000e+00> : vector<256x128xf32>
    %2 = tpu.matmul %0, %1, %cst {dimension_numbers = #tpu.dot_dimension_numbers<[1], [0], [0], [1], [0, 0, 1, 1], [], []>} : vector<256x128xbf16>, vector<128x128xbf16>, vector<256x128xf32> -> vector<256x128xf32>
    %c0_3 = arith.constant 0 : index
    %c0_4 = arith.constant 0 : index
    %3 = vector.load %arg4[%c0_3, %c0_4] : memref<1x128xf32, #tpu.memory_space<vmem>>, vector<1x128xf32>
    %4 = vector.broadcast %3 : vector<1x128xf32> to vector<256x128xf32>
    %5 = arith.addf %2, %4 : vector<256x128xf32>
    %cst_5 = arith.constant 0.000000e+00 : f32
    %6 = vector.broadcast %cst_5 : f32 to vector<256x128xf32>
    %7 = arith.cmpf oge, %5, %6 : vector<256x128xf32>
    %cst_6 = arith.constant 2.000000e-01 : f32
    %8 = vector.broadcast %cst_6 : f32 to vector<256x128xf32>
    %9 = arith.mulf %8, %5 : vector<256x128xf32>
    %10 = arith.select %7, %5, %9 : vector<256x128xi1>, vector<256x128xf32>
    %11 = arith.truncf %10 : vector<256x128xf32> to vector<256x128xbf16>
    %c0_7 = arith.constant 0 : index
    %c0_8 = arith.constant 0 : index
    %12 = vector.load %arg5[%c0_7, %c0_8] : memref<256x128xbf16, #tpu.memory_space<vmem>>, vector<256x128xbf16>
    tpu.vector_store %arg5[%c0_7, %c0_8], %11 {strides = array<i32>} : memref<256x128xbf16, #tpu.memory_space<vmem>>, vector<256x128xbf16>,
    return
  }
  func.func @transform_0(%arg0: i32, %arg1: i32) -> (i32, i32) {
    %c0_i32 = arith.constant 0 : i32
    %c0_i32_0 = arith.constant 0 : i32
    return %arg0, %c0_i32 : i32, i32
  }
  func.func @transform_1(%arg0: i32, %arg1: i32) -> (i32, i32) {
    %c0_i32 = arith.constant 0 : i32
    %c0_i32_0 = arith.constant 0 : i32
    return %c0_i32, %arg1 : i32, i32
  }
  func.func @transform_2(%arg0: i32, %arg1: i32) -> (i32, i32) {
    %c0_i32 = arith.constant 0 : i32
    %c0_i32_0 = arith.constant 0 : i32
    return %c0_i32, %arg1 : i32, i32
  }
  func.func @transform_3(%arg0: i32, %arg1: i32) -> (i32, i32) {
    %c0_i32 = arith.constant 0 : i32
    return %arg0, %arg1 : i32, i32
  }
}

module attributes {stable_mosaic.version = 11 : i64} {
  func.func @_gemm_single_k_kernel(%arg0: i32, %arg1: i32, %arg2: memref<64x128xbf16, #tpu.memory_space<vmem>>, %arg3: memref<128x128xbf16, #tpu.memory_space<vmem>>, %arg4: memref<1x128xf32, #tpu.memory_space<vmem>>, %arg5: memref<64x128xbf16, #tpu.memory_space<vmem>>) attributes {dimension_semantics = [#tpu.dimension_semantics<parallel>, #tpu.dimension_semantics<parallel>], iteration_bounds = array<i64: 2, 1>, scalar_prefetch = 0 : i64, scratch_operands = 0 : i64, tpu.core_type = #tpu.core_type<tc>, window_params = [{transform_indices = @transform_0, window_bounds = array<i64: 64, 128>}, {transform_indices = @transform_1, window_bounds = array<i64: 128, 128>}, {transform_indices = @transform_2, window_bounds = array<i64: 1, 128>}, {transform_indices = @transform_3, window_bounds = array<i64: 64, 128>}]} {
    %c0 = arith.constant 0 : index
    %c0_0 = arith.constant 0 : index
    %0 = vector.load %arg2[%c0, %c0_0] : memref<64x128xbf16, #tpu.memory_space<vmem>>, vector<64x128xbf16>
    %c0_1 = arith.constant 0 : index
    %c0_2 = arith.constant 0 : index
    %1 = vector.load %arg3[%c0_1, %c0_2] : memref<128x128xbf16, #tpu.memory_space<vmem>>, vector<128x128xbf16>
    %cst = arith.constant dense<0.000000e+00> : vector<64x128xf32>
    %2 = tpu.matmul %0, %1, %cst {dimension_numbers = #tpu.dot_dimension_numbers<[1], [0], [0], [1], [0, 0, 1, 1], [], []>} : vector<64x128xbf16>, vector<128x128xbf16>, vector<64x128xf32> -> vector<64x128xf32>
    %c0_3 = arith.constant 0 : index
    %c0_4 = arith.constant 0 : index
    %3 = vector.load %arg4[%c0_3, %c0_4] : memref<1x128xf32, #tpu.memory_space<vmem>>, vector<1x128xf32>
    %4 = vector.broadcast %3 : vector<1x128xf32> to vector<64x128xf32>
    %5 = arith.addf %2, %4 : vector<64x128xf32>
    %cst_5 = arith.constant 0.000000e+00 : f32
    %6 = vector.broadcast %cst_5 : f32 to vector<64x128xf32>
    %7 = arith.cmpf oge, %5, %6 : vector<64x128xf32>
    %cst_6 = arith.constant 2.000000e-01 : f32
    %8 = vector.broadcast %cst_6 : f32 to vector<64x128xf32>
    %9 = arith.mulf %8, %5 : vector<64x128xf32>
    %10 = arith.select %7, %5, %9 : vector<64x128xi1>, vector<64x128xf32>
    %11 = arith.truncf %10 : vector<64x128xf32> to vector<64x128xbf16>
    %c0_7 = arith.constant 0 : index
    %c0_8 = arith.constant 0 : index
    %12 = vector.load %arg5[%c0_7, %c0_8] : memref<64x128xbf16, #tpu.memory_space<vmem>>, vector<64x128xbf16>
    tpu.vector_store %arg5[%c0_7, %c0_8], %11 {strides = array<i32>} : memref<64x128xbf16, #tpu.memory_space<vmem>>, vector<64x128xbf16>,
    return
  }
  func.func @transform_0(%arg0: i32, %arg1: i32) -> (i32, i32) {
    %c0_i32 = arith.constant 0 : i32
    %c0_i32_0 = arith.constant 0 : i32
    return %arg0, %c0_i32 : i32, i32
  }
  func.func @transform_1(%arg0: i32, %arg1: i32) -> (i32, i32) {
    %c0_i32 = arith.constant 0 : i32
    %c0_i32_0 = arith.constant 0 : i32
    return %c0_i32, %arg1 : i32, i32
  }
  func.func @transform_2(%arg0: i32, %arg1: i32) -> (i32, i32) {
    %c0_i32 = arith.constant 0 : i32
    %c0_i32_0 = arith.constant 0 : i32
    return %c0_i32, %arg1 : i32, i32
  }
  func.func @transform_3(%arg0: i32, %arg1: i32) -> (i32, i32) {
    %c0_i32 = arith.constant 0 : i32
    return %arg0, %arg1 : i32, i32
  }
}

module attributes {stable_mosaic.version = 11 : i64} {
  func.func @_gemm_single_k_kernel(%arg0: i32, %arg1: i32, %arg2: memref<16x256xbf16, #tpu.memory_space<vmem>>, %arg3: memref<256x128xbf16, #tpu.memory_space<vmem>>, %arg4: memref<1x128xf32, #tpu.memory_space<vmem>>, %arg5: memref<16x128xbf16, #tpu.memory_space<vmem>>) attributes {dimension_semantics = [#tpu.dimension_semantics<parallel>, #tpu.dimension_semantics<parallel>], iteration_bounds = array<i64: 2, 1>, scalar_prefetch = 0 : i64, scratch_operands = 0 : i64, tpu.core_type = #tpu.core_type<tc>, window_params = [{transform_indices = @transform_0, window_bounds = array<i64: 16, 256>}, {transform_indices = @transform_1, window_bounds = array<i64: 256, 128>}, {transform_indices = @transform_2, window_bounds = array<i64: 1, 128>}, {transform_indices = @transform_3, window_bounds = array<i64: 16, 128>}]} {
    %c0 = arith.constant 0 : index
    %c0_0 = arith.constant 0 : index
    %0 = vector.load %arg2[%c0, %c0_0] : memref<16x256xbf16, #tpu.memory_space<vmem>>, vector<16x256xbf16>
    %c0_1 = arith.constant 0 : index
    %c0_2 = arith.constant 0 : index
    %1 = vector.load %arg3[%c0_1, %c0_2] : memref<256x128xbf16, #tpu.memory_space<vmem>>, vector<256x128xbf16>
    %cst = arith.constant dense<0.000000e+00> : vector<16x128xf32>
    %2 = tpu.matmul %0, %1, %cst {dimension_numbers = #tpu.dot_dimension_numbers<[1], [0], [0], [1], [0, 0, 1, 1], [], []>} : vector<16x256xbf16>, vector<256x128xbf16>, vector<16x128xf32> -> vector<16x128xf32>
    %c0_3 = arith.constant 0 : index
    %c0_4 = arith.constant 0 : index
    %3 = vector.load %arg4[%c0_3, %c0_4] : memref<1x128xf32, #tpu.memory_space<vmem>>, vector<1x128xf32>
    %4 = vector.broadcast %3 : vector<1x128xf32> to vector<16x128xf32>
    %5 = arith.addf %2, %4 : vector<16x128xf32>
    %cst_5 = arith.constant 0.000000e+00 : f32
    %6 = vector.broadcast %cst_5 : f32 to vector<16x128xf32>
    %7 = arith.cmpf oge, %5, %6 : vector<16x128xf32>
    %cst_6 = arith.constant 2.000000e-01 : f32
    %8 = vector.broadcast %cst_6 : f32 to vector<16x128xf32>
    %9 = arith.mulf %8, %5 : vector<16x128xf32>
    %10 = arith.select %7, %5, %9 : vector<16x128xi1>, vector<16x128xf32>
    %11 = arith.truncf %10 : vector<16x128xf32> to vector<16x128xbf16>
    %c0_7 = arith.constant 0 : index
    %c0_8 = arith.constant 0 : index
    %12 = vector.load %arg5[%c0_7, %c0_8] : memref<16x128xbf16, #tpu.memory_space<vmem>>, vector<16x128xbf16>
    tpu.vector_store %arg5[%c0_7, %c0_8], %11 {strides = array<i32>} : memref<16x128xbf16, #tpu.memory_space<vmem>>, vector<16x128xbf16>,
    return
  }
  func.func @transform_0(%arg0: i32, %arg1: i32) -> (i32, i32) {
    %c0_i32 = arith.constant 0 : i32
    %c0_i32_0 = arith.constant 0 : i32
    return %arg0, %c0_i32 : i32, i32
  }
  func.func @transform_1(%arg0: i32, %arg1: i32) -> (i32, i32) {
    %c0_i32 = arith.constant 0 : i32
    %c0_i32_0 = arith.constant 0 : i32
    return %c0_i32, %arg1 : i32, i32
  }
  func.func @transform_2(%arg0: i32, %arg1: i32) -> (i32, i32) {
    %c0_i32 = arith.constant 0 : i32
    %c0_i32_0 = arith.constant 0 : i32
    return %c0_i32, %arg1 : i32, i32
  }
  func.func @transform_3(%arg0: i32, %arg1: i32) -> (i32, i32) {
    %c0_i32 = arith.constant 0 : i32
    return %arg0, %arg1 : i32, i32
  }
}

module attributes {stable_mosaic.version = 11 : i64} {
  func.func @_gemm_single_k_kernel(%arg0: i32, %arg1: i32, %arg2: memref<16x512xbf16, #tpu.memory_space<vmem>>, %arg3: memref<512x128xbf16, #tpu.memory_space<vmem>>, %arg4: memref<1x128xf32, #tpu.memory_space<vmem>>, %arg5: memref<16x128xbf16, #tpu.memory_space<vmem>>) attributes {dimension_semantics = [#tpu.dimension_semantics<parallel>, #tpu.dimension_semantics<parallel>], iteration_bounds = array<i64: 2, 1>, scalar_prefetch = 0 : i64, scratch_operands = 0 : i64, tpu.core_type = #tpu.core_type<tc>, window_params = [{transform_indices = @transform_0, window_bounds = array<i64: 16, 512>}, {transform_indices = @transform_1, window_bounds = array<i64: 512, 128>}, {transform_indices = @transform_2, window_bounds = array<i64: 1, 128>}, {transform_indices = @transform_3, window_bounds = array<i64: 16, 128>}]} {
    %c0 = arith.constant 0 : index
    %c0_0 = arith.constant 0 : index
    %0 = vector.load %arg2[%c0, %c0_0] : memref<16x512xbf16, #tpu.memory_space<vmem>>, vector<16x512xbf16>
    %c0_1 = arith.constant 0 : index
    %c0_2 = arith.constant 0 : index
    %1 = vector.load %arg3[%c0_1, %c0_2] : memref<512x128xbf16, #tpu.memory_space<vmem>>, vector<512x128xbf16>
    %cst = arith.constant dense<0.000000e+00> : vector<16x128xf32>
    %2 = tpu.matmul %0, %1, %cst {dimension_numbers = #tpu.dot_dimension_numbers<[1], [0], [0], [1], [0, 0, 1, 1], [], []>} : vector<16x512xbf16>, vector<512x128xbf16>, vector<16x128xf32> -> vector<16x128xf32>
    %c0_3 = arith.constant 0 : index
    %c0_4 = arith.constant 0 : index
    %3 = vector.load %arg4[%c0_3, %c0_4] : memref<1x128xf32, #tpu.memory_space<vmem>>, vector<1x128xf32>
    %4 = vector.broadcast %3 : vector<1x128xf32> to vector<16x128xf32>
    %5 = arith.addf %2, %4 : vector<16x128xf32>
    %cst_5 = arith.constant 0.000000e+00 : f32
    %6 = vector.broadcast %cst_5 : f32 to vector<16x128xf32>
    %7 = arith.cmpf oge, %5, %6 : vector<16x128xf32>
    %cst_6 = arith.constant 2.000000e-01 : f32
    %8 = vector.broadcast %cst_6 : f32 to vector<16x128xf32>
    %9 = arith.mulf %8, %5 : vector<16x128xf32>
    %10 = arith.select %7, %5, %9 : vector<16x128xi1>, vector<16x128xf32>
    %11 = arith.truncf %10 : vector<16x128xf32> to vector<16x128xbf16>
    %c0_7 = arith.constant 0 : index
    %c0_8 = arith.constant 0 : index
    %12 = vector.load %arg5[%c0_7, %c0_8] : memref<16x128xbf16, #tpu.memory_space<vmem>>, vector<16x128xbf16>
    tpu.vector_store %arg5[%c0_7, %c0_8], %11 {strides = array<i32>} : memref<16x128xbf16, #tpu.memory_space<vmem>>, vector<16x128xbf16>,
    return
  }
  func.func @transform_0(%arg0: i32, %arg1: i32) -> (i32, i32) {
    %c0_i32 = arith.constant 0 : i32
    %c0_i32_0 = arith.constant 0 : i32
    return %arg0, %c0_i32 : i32, i32
  }
  func.func @transform_1(%arg0: i32, %arg1: i32) -> (i32, i32) {
    %c0_i32 = arith.constant 0 : i32
    %c0_i32_0 = arith.constant 0 : i32
    return %c0_i32, %arg1 : i32, i32
  }
  func.func @transform_2(%arg0: i32, %arg1: i32) -> (i32, i32) {
    %c0_i32 = arith.constant 0 : i32
    %c0_i32_0 = arith.constant 0 : i32
    return %c0_i32, %arg1 : i32, i32
  }
  func.func @transform_3(%arg0: i32, %arg1: i32) -> (i32, i32) {
    %c0_i32 = arith.constant 0 : i32
    return %arg0, %arg1 : i32, i32
  }
}

module attributes {stable_mosaic.version = 11 : i64} {
  func.func @_matvec_single_k_kernel(%arg0: i32, %arg1: memref<16x1024xbf16, #tpu.memory_space<vmem>>, %arg2: memref<1x1024xbf16, #tpu.memory_space<vmem>>, %arg3: memref<1x1xf32, #tpu.memory_space<vmem>>, %arg4: memref<16x1xf32, #tpu.memory_space<vmem>>) attributes {dimension_semantics = [#tpu.dimension_semantics<parallel>], iteration_bounds = array<i64: 1>, scalar_prefetch = 0 : i64, scratch_operands = 0 : i64, tpu.core_type = #tpu.core_type<tc>, window_params = [{transform_indices = @transform_0, window_bounds = array<i64: 16, 1024>}, {pipeline_mode = #tpu.pipeline_mode<synchronous>, transform_indices = @transform_1, window_bounds = array<i64: 1, 1024>}, {pipeline_mode = #tpu.pipeline_mode<synchronous>, transform_indices = @transform_2, window_bounds = array<i64: 1, 1>}, {transform_indices = @transform_3, window_bounds = array<i64: 16, 1>}]} {
    %c0 = arith.constant 0 : index
    %c0_0 = arith.constant 0 : index
    %0 = vector.load %arg1[%c0, %c0_0] : memref<16x1024xbf16, #tpu.memory_space<vmem>>, vector<16x1024xbf16>
    %1 = arith.extf %0 : vector<16x1024xbf16> to vector<16x1024xf32>
    %c0_1 = arith.constant 0 : index
    %c0_2 = arith.constant 0 : index
    %2 = vector.load %arg2[%c0_1, %c0_2] : memref<1x1024xbf16, #tpu.memory_space<vmem>>, vector<1x1024xbf16>
    %3 = arith.extf %2 : vector<1x1024xbf16> to vector<1x1024xf32>
    %4 = vector.broadcast %3 : vector<1x1024xf32> to vector<16x1024xf32>
    %5 = arith.mulf %1, %4 : vector<16x1024xf32>
    %cst = arith.constant dense<0.000000e+00> : vector<16xf32>
    %6 = vector.multi_reduction <add>, %5, %cst [1] : vector<16x1024xf32> to vector<16xf32>
    %7 = vector.shape_cast %6 : vector<16xf32> to vector<16x1xf32>
    %c0_3 = arith.constant 0 : index
    %c0_4 = arith.constant 0 : index
    %8 = vector.load %arg3[%c0_3, %c0_4] : memref<1x1xf32, #tpu.memory_space<vmem>>, vector<1x1xf32>
    %9 = vector.broadcast %8 : vector<1x1xf32> to vector<16x1xf32>
    %10 = arith.addf %7, %9 : vector<16x1xf32>
    %c0_5 = arith.constant 0 : index
    %c0_6 = arith.constant 0 : index
    %11 = vector.load %arg4[%c0_5, %c0_6] : memref<16x1xf32, #tpu.memory_space<vmem>>, vector<16x1xf32>
    tpu.vector_store %arg4[%c0_5, %c0_6], %10 {strides = array<i32>} : memref<16x1xf32, #tpu.memory_space<vmem>>, vector<16x1xf32>,
    return
  }
  func.func @transform_0(%arg0: i32) -> (i32, i32) {
    %c0_i32 = arith.constant 0 : i32
    %c0_i32_0 = arith.constant 0 : i32
    return %arg0, %c0_i32 : i32, i32
  }
  func.func @transform_1(%arg0: i32) -> (i32, i32) {
    %c0_i32 = arith.constant 0 : i32
    %c0_i32_0 = arith.constant 0 : i32
    %c0_i32_1 = arith.constant 0 : i32
    return %c0_i32, %c0_i32_0 : i32, i32
  }
  func.func @transform_2(%arg0: i32) -> (i32, i32) {
    %c0_i32 = arith.constant 0 : i32
    %c0_i32_0 = arith.constant 0 : i32
    %c0_i32_1 = arith.constant 0 : i32
    return %c0_i32, %c0_i32_0 : i32, i32
  }
  func.func @transform_3(%arg0: i32) -> (i32, i32) {
    %c0_i32 = arith.constant 0 : i32
    %c0_i32_0 = arith.constant 0 : i32
    return %arg0, %c0_i32 : i32, i32
  }
}

</mosaic_0001>

<bundles_post_ra>
// kernel: _lambda_.5
= control target key start
LH: loop header
LB: loop body
LE: loop exit
PB: predicated region body
PF: predicated region fallthrough
CT: control target
= control target key end

     0   :  { %s1321_s12 = smov 0   ;;  %s1323_s13 = smov 0   ;;  %s1464_s0 = inlined_call_operand.vmem [shape: bf16[512,128], index: 0, kind: input, shape index: {}]   ;;  %s1465_s1 = inlined_call_operand.vmem [shape: bf16[128,128], index: 1, kind: input, shape index: {}]   ;;  %s1466_s2 = inlined_call_operand.vmem [shape: f32[1,128], index: 2, kind: input, shape index: {}]   ;;  %s1467_s3 = inlined_call_operand.vmem [shape: bf16[512,128], index: 3, kind: output, shape index: {}]  }
   0x1   :  { %s1325_s14 = smov 0  }
   0x2 LB: > { %s25_s15 = sadd.s32 1, %s1295_s13  ;;  %p950_p0 = scmp.ge.s32.totalorder %s1299_s14, 1  ;;  %s1299_s14 = sphi %s1325_s14, %s13_s14   ;;  %s1295_s13 = sphi %s1323_s13, %s1469_s13   ;;  %s1291_s12 = sphi %s1321_s12, %s1468_s12  }
   0x3   : > { %p27_p1 = scmp.ge.s32.totalorder %s25_s15, 2  ;;  %p169_p2 = scmp.lt.s32.totalorder %s1299_s14, 3 }
   0x5   : > { %s1471_s15 = smov (%p27_p1, %s25_s15), 0  ;;  %p170_p3 = pnand %p950_p0, %p169_p2 }
   0x6   : > { %v1253_v0 = vld [vmem:[%s1465_s1] sm:$0xff] (!%p170_p3)   ;;  %s951_s18 = sshll.u32 (!%p170_p3), %s1291_s12, 5  ;;  %v1254_v1 = vld [vmem:[%s1465_s1 + $0x8] sm:$0xff] (!%p170_p3)   ;;  %v1255_v2 = vld [vmem:[%s1465_s1 + $0x10] sm:$0xff] (!%p170_p3)  }
   0x7   : > { %173 = sbr.rel (%p170_p3) target bundleno = 294 (0x126), region = 32  ;;  %p204_p4 = scmp.lt.s32.totalorder (!%p170_p3), %s951_s18, 63  ;;  %1165 = vmatprep.subr.bf16.mxu0 (!%p170_p3), %v1253_v0  ;;  %1213 = vmatprep.subr.bf16.mxu1 (!%p170_p3), %v1253_v0  ;;  %v1256_v3 = vld [vmem:[%s1465_s1 + $0x18] sm:$0xff] (!%p170_p3)   ;;  %v1257_v6 = vld [vmem:[%s1465_s1 + $0x20] sm:$0xff] (!%p170_p3)   ;;  %v1258_v7 = vld [vmem:[%s1465_s1 + $0x28] sm:$0xff] (!%p170_p3)  }
   0x8   : > { %1166 = vmatpush3.bf16.msra.mxu0 (!%p170_p3), %v1253_v0  ;;  %1221 = vmatpush3.bf16.msra.mxu1 (!%p170_p3), %v1253_v0  ;;  %v1259_v8 = vld [vmem:[%s1465_s1 + $0x30] sm:$0xff] (!%p170_p3)   ;;  %v1260_v9 = vld [vmem:[%s1465_s1 + $0x38] sm:$0xff] (!%p170_p3)   ;;  %v1392_v24 = vld [vmem:[%s1466_s2] ss:$0 sm:$0xff] (!%p170_p3) }
   0x9   : > { %1167 = vmatprep.subr.bf16.mxu0 (!%p170_p3), %v1254_v1  ;;  %1214 = vmatprep.subr.bf16.mxu1 (!%p170_p3), %v1254_v1 }
   0xc   : > { %1168 = vmatpush3.bf16.msra.mxu0 (!%p170_p3), %v1254_v1  ;;  %1222 = vmatpush3.bf16.msra.mxu1 (!%p170_p3), %v1254_v1 }
   0xd   : > { %1169 = vmatprep.subr.bf16.mxu0 (!%p170_p3), %v1255_v2  ;;  %1215 = vmatprep.subr.bf16.mxu1 (!%p170_p3), %v1255_v2 }
   0xe   : > { %s1473_s18 = smov (!%p204_p4, %s951_s18), 63 }
   0xf   : > { %s952_s23 = sshll.u32 %s1473_s18, 2 }
  0x10   : > { %s1356_s26 = scalar_lea.vmem %s1464_s0, %s952_s23  ;;  %1170 = vmatpush3.bf16.msra.mxu0 %v1255_v2  ;;  %1223 = vmatpush3.bf16.msra.mxu1 %v1255_v2  ;;  %s1409_s17 = scalar_lea.vmem %s1467_s3, %s952_s23 }
  0x11   : > { %v1261_v4 = vld [vmem:[%s1356_s26] sm:$0xff]   ;;  %1171 = vmatprep.subr.bf16.mxu0 %v1256_v3  ;;  %1216 = vmatprep.subr.bf16.mxu1 %v1256_v3  ;;  %v1263_v10 = vld [vmem:[%s1356_s26 + $0x8] sm:$0xff]   ;;  %v1265_v12 = vld [vmem:[%s1356_s26 + $0x10] sm:$0xff]  }
  0x12   : > { %v1262_v5 = vld [vmem:[%s1356_s26 + $0x40] sm:$0xff]   ;;  %1181 = vmatprep.mubr.bf16.mxu0 %v1261_v4  ;;  %v1264_v11 = vld [vmem:[%s1356_s26 + $0x48] sm:$0xff]   ;;  %v1266_v13 = vld [vmem:[%s1356_s26 + $0x50] sm:$0xff]  }
  0x13   : > { %1197 = vmatprep.mubr.bf16.mxu1 %v1262_v5  ;;  %v1267_v14 = vld [vmem:[%s1356_s26 + $0x18] sm:$0xff]   ;;  %v1269_v16 = vld [vmem:[%s1356_s26 + $0x20] sm:$0xff]   ;;  %v1271_v18 = vld [vmem:[%s1356_s26 + $0x28] sm:$0xff]  }
  0x14   : > { %1172 = vmatpush3.bf16.msra.mxu0 %v1256_v3  ;;  %1224 = vmatpush3.bf16.msra.mxu1 %v1256_v3  ;;  %v1268_v15 = vld [vmem:[%s1356_s26 + $0x58] sm:$0xff]   ;;  %v1270_v17 = vld [vmem:[%s1356_s26 + $0x60] sm:$0xff]   ;;  %v1272_v19 = vld [vmem:[%s1356_s26 + $0x68] sm:$0xff]  }
  0x15   : > { %1173 = vmatprep.subr.bf16.mxu0 %v1257_v6  ;;  %1217 = vmatprep.subr.bf16.mxu1 %v1257_v6  ;;  %v1273_v20 = vld [vmem:[%s1356_s26 + $0x30] sm:$0xff]   ;;  %v1275_v22 = vld [vmem:[%s1356_s26 + $0x38] sm:$0xff]  }
  0x16   : > { %v1274_v21 = vld [vmem:[%s1356_s26 + $0x70] sm:$0xff]   ;;  %v1276_v23 = vld [vmem:[%s1356_s26 + $0x78] sm:$0xff]  }
  0x18   : > { %1174 = vmatpush3.bf16.msra.mxu0 %v1257_v6  ;;  %1225 = vmatpush3.bf16.msra.mxu1 %v1257_v6 }
  0x19   : > { %1175 = vmatprep.subr.bf16.mxu0 %v1258_v7  ;;  %1218 = vmatprep.subr.bf16.mxu1 %v1258_v7 }
  0x1c   : > { %1176 = vmatpush3.bf16.msra.mxu0 %v1258_v7  ;;  %1226 = vmatpush3.bf16.msra.mxu1 %v1258_v7 }
  0x1d   : > { %1177 = vmatprep.subr.bf16.mxu0 %v1259_v8  ;;  %1219 = vmatprep.subr.bf16.mxu1 %v1259_v8 }
  0x20   : > { %1178 = vmatpush3.bf16.msra.mxu0 %v1259_v8  ;;  %1227 = vmatpush3.bf16.msra.mxu1 %v1259_v8 }
  0x21   : > { %1179 = vmatprep.subr.bf16.mxu0 %v1260_v9  ;;  %1220 = vmatprep.subr.bf16.mxu1 %v1260_v9 }
  0x24   : > { %1180 = vmatpush3.bf16.msra.mxu0 %v1260_v9  ;;  %1228 = vmatpush3.bf16.msra.mxu1 %v1260_v9 }
  0x27   : > { %1182 = vmatmul.mubr.bf16.vlgmr.msra.gmra.mrb[0].mxu0 %v1263_v10  ;;  %1198 = vmatmul.mubr.bf16.vlgmr.msra.gmra.mrb[0].mxu1 %v1264_v11 }
  0x28   : > { %1185 = vmatprep.mubr.bf16.mxu0 %v1265_v12  ;;  %1201 = vmatprep.mubr.bf16.mxu1 %v1266_v13 }
  0x2f   : > { %1186 = vmatmul.mubr.bf16.gmra.mrb[4].mxu0 %v1267_v14  ;;  %1202 = vmatmul.mubr.bf16.gmra.mrb[4].mxu1 %v1268_v15 }
  0x30   : > { %1189 = vmatprep.mubr.bf16.mxu0 %v1269_v16  ;;  %1205 = vmatprep.mubr.bf16.mxu1 %v1270_v17 }
  0x37   : > { %1190 = vmatmul.mubr.bf16.gmra.mrb[8].mxu0 %v1271_v18  ;;  %1206 = vmatmul.mubr.bf16.gmra.mrb[8].mxu1 %v1272_v19 }
  0x38   : > { %1193 = vmatprep.mubr.bf16.mxu0 %v1273_v20  ;;  %1209 = vmatprep.mubr.bf16.mxu1 %v1274_v21 }
  0x3f   : > { %1194 = vmatmul.mubr.bf16.gmra.mrb[12].mxu0 %v1275_v22  ;;  %1210 = vmatmul.mubr.bf16.gmra.mrb[12].mxu1 %v1276_v23 }
  0xfa   : > { %v1183_v25 = vpop.f32.mrb[0].mxu0  ;;  %v1199_v26 = vpop.f32.mrb[0].mxu1 }
  0xfb   : > { %v468_v27 = vadd.f32 %v1183_v25, %v1392_v24  ;;  %v532_v28 = vadd.f32 %v1199_v26, %v1392_v24  ;;  %v459_v29 = vpop.f32.mrb[1].mxu0  ;;  %v523_v30 = vpop.f32.mrb[1].mxu1 }
  0xfc   : > { %v460_v31 = vadd.f32 %v1392_v24, %v459_v29  ;;  %v524_v32 = vadd.f32 %v1392_v24, %v523_v30  ;;  %v1184_v33 = vpop.f32.mrb[2].mxu0  ;;  %v1200_v34 = vpop.f32.mrb[2].mxu1 }
  0xfd   : > { %vm588_vm0 = vcmp.ge.f32.partialorder %v468_v27, 0.0  ;;  %v620_v35 = vmul.f32 0.2, %v468_v27  ;;  %vm604_vm1 = vcmp.ge.f32.partialorder %v532_v28, 0.0  ;;  %v636_v36 = vmul.f32 0.2, %v532_v28 }
  0xfe   : > { %vm586_vm2 = vcmp.ge.f32.partialorder %v460_v31, 0.0  ;;  %v618_v37 = vmul.f32 0.2, %v460_v31  ;;  %vm602_vm3 = vcmp.ge.f32.partialorder %v524_v32, 0.0  ;;  %v634_v38 = vmul.f32 0.2, %v524_v32 }
  0xff   : > { %v471_v39 = vadd.f32 %v1184_v33, %v1392_v24  ;;  %v535_v40 = vadd.f32 %v1200_v34, %v1392_v24  ;;  %v462_v41 = vpop.f32.mrb[3].mxu0  ;;  %v526_v42 = vpop.f32.mrb[3].mxu1  ;;  %v652_v43 = vsel %vm588_vm0, %v468_v27, %v620_v35  ;;  %v668_v44 = vsel %vm604_vm1, %v532_v28, %v636_v36 }
 0x100   : > { %v463_v45 = vadd.f32 %v1392_v24, %v462_v41  ;;  %v527_v46 = vadd.f32 %v1392_v24, %v526_v42  ;;  %v650_v51 = vsel %vm586_vm2, %v460_v31, %v618_v37  ;;  %v666_v52 = vsel %vm602_vm3, %v524_v32, %v634_v38 }
 0x101   : > { %vm589_vm4 = vcmp.ge.f32.partialorder %v471_v39, 0.0  ;;  %v621_v47 = vmul.f32 0.2, %v471_v39  ;;  %vm605_vm5 = vcmp.ge.f32.partialorder %v535_v40, 0.0  ;;  %v637_v48 = vmul.f32 0.2, %v535_v40 }
 0x102   : > { %vm587_vm6 = vcmp.ge.f32.partialorder %v463_v45, 0.0  ;;  %v619_v49 = vmul.f32 0.2, %v463_v45  ;;  %vm603_vm7 = vcmp.ge.f32.partialorder %v527_v46, 0.0  ;;  %v635_v50 = vmul.f32 0.2, %v527_v46 }
 0x103   : > { %v653_v53 = vsel %vm589_vm4, %v471_v39, %v621_v47  ;;  %v669_v54 = vsel %vm605_vm5, %v535_v40, %v637_v48  ;;  %v1187_v55 = vpop.f32.mrb[4].mxu0  ;;  %v1203_v56 = vpop.f32.mrb[4].mxu1 }
 0x104   : > { %v1054_v57 = vpack.c.bf16 %v653_v53, %v652_v43  ;;  %v1094_v58 = vpack.c.bf16 %v669_v54, %v668_v44  ;;  %v651_v59 = vsel %vm587_vm6, %v463_v45, %v619_v49  ;;  %v667_v60 = vsel %vm603_vm7, %v527_v46, %v635_v50  ;;  %v475_v61 = vpop.f32.mrb[5].mxu0  ;;  %v539_v62 = vpop.f32.mrb[5].mxu1 }
 0x105   : > { %v1049_v63 = vpack.c.bf16 %v651_v59, %v650_v51  ;;  %v1089_v0 = vpack.c.bf16 %v667_v60, %v666_v52  ;;  %v484_v1 = vadd.f32 %v1187_v55, %v1392_v24  ;;  %v548_v2 = vadd.f32 %v1203_v56, %v1392_v24  ;;  %v1188_v3 = vpop.f32.mrb[6].mxu0  ;;  %v1204_v4 = vpop.f32.mrb[6].mxu1 }
 0x106   : > { %1126 = vst [vmem:[%s1409_s17 + $0x8] sm:$0xff] %v1054_v57   ;;  %1134 = vst [vmem:[%s1409_s17 + $0x48] sm:$0xff] %v1094_v58   ;;  %v476_v5 = vadd.f32 %v1392_v24, %v475_v61  ;;  %v540_v6 = vadd.f32 %v1392_v24, %v539_v62  ;;  %v487_v7 = vadd.f32 %v1188_v3, %v1392_v24  ;;  %v478_v9 = vpop.f32.mrb[7].mxu0  ;;  %v542_v10 = vpop.f32.mrb[7].mxu1 }
 0x107   : > { %v551_v8 = vadd.f32 %v1204_v4, %v1392_v24  ;;  %1050 = vst [vmem:[%s1409_s17] sm:$0xff] %v1049_v63   ;;  %1133 = vst [vmem:[%s1409_s17 + $0x40] sm:$0xff] %v1089_v0   ;;  %vm592_vm8 = vcmp.ge.f32.partialorder %v484_v1, 0.0  ;;  %v624_v11 = vmul.f32 0.2, %v484_v1  ;;  %vm608_vm9 = vcmp.ge.f32.partialorder %v548_v2, 0.0 }
 0x108   : > { %v640_v12 = vmul.f32 0.2, %v548_v2  ;;  %vm590_vm10 = vcmp.ge.f32.partialorder %v476_v5, 0.0  ;;  %v622_v13 = vmul.f32 0.2, %v476_v5  ;;  %vm606_vm11 = vcmp.ge.f32.partialorder %v540_v6, 0.0 }
 0x109   : > { %v656_v14 = vsel %vm592_vm8, %v484_v1, %v624_v11  ;;  %v638_v15 = vmul.f32 0.2, %v540_v6  ;;  %vm593_vm12 = vcmp.ge.f32.partialorder %v487_v7, 0.0  ;;  %v625_v16 = vmul.f32 0.2, %v487_v7 }
 0x10a   : > { %v672_v17 = vsel %vm608_vm9, %v548_v2, %v640_v12  ;;  %v654_v18 = vsel %vm590_vm10, %v476_v5, %v622_v13  ;;  %vm609_vm13 = vcmp.ge.f32.partialorder %v551_v8, 0.0  ;;  %v641_v19 = vmul.f32 0.2, %v551_v8  ;;  %v1191_v20 = vpop.f32.mrb[8].mxu0  ;;  %v1207_v21 = vpop.f32.mrb[8].mxu1 }
 0x10b   : > { %v657_v22 = vsel %vm593_vm12, %v487_v7, %v625_v16  ;;  %v479_v23 = vadd.f32 %v1392_v24, %v478_v9  ;;  %v543_v25 = vadd.f32 %v1392_v24, %v542_v10  ;;  %v500_v26 = vadd.f32 %v1191_v20, %v1392_v24  ;;  %v491_v27 = vpop.f32.mrb[9].mxu0  ;;  %v555_v28 = vpop.f32.mrb[9].mxu1 }
 0x10c   : > { %v1064_v29 = vpack.c.bf16 %v657_v22, %v656_v14  ;;  %v673_v30 = vsel %vm609_vm13, %v551_v8, %v641_v19  ;;  %v564_v31 = vadd.f32 %v1207_v21, %v1392_v24  ;;  %v492_v32 = vadd.f32 %v1392_v24, %v491_v27  ;;  %v1192_v33 = vpop.f32.mrb[10].mxu0  ;;  %v1208_v34 = vpop.f32.mrb[10].mxu1 }
 0x10d   : > { %v1104_v35 = vpack.c.bf16 %v673_v30, %v672_v17  ;;  %vm591_vm14 = vcmp.ge.f32.partialorder %v479_v23, 0.0  ;;  %v623_v36 = vmul.f32 0.2, %v479_v23  ;;  %vm607_vm15 = vcmp.ge.f32.partialorder %v543_v25, 0.0  ;;  %v494_v37 = vpop.f32.mrb[11].mxu0  ;;  %v558_v38 = vpop.f32.mrb[11].mxu1 }
 0x10e   : > { %1128 = vst [vmem:[%s1409_s17 + $0x18] sm:$0xff] %v1064_v29   ;;  %v639_v39 = vmul.f32 0.2, %v543_v25  ;;  %vm596_vm0 = vcmp.ge.f32.partialorder %v500_v26, 0.0  ;;  %v628_v40 = vmul.f32 0.2, %v500_v26  ;;  %v670_v41 = vsel %vm606_vm11, %v540_v6, %v638_v15 }
 0x10f   : > { %vm612_vm1 = vcmp.ge.f32.partialorder %v564_v31, 0.0  ;;  %1136 = vst [vmem:[%s1409_s17 + $0x58] sm:$0xff] %v1104_v35   ;;  %v655_v42 = vsel %vm591_vm14, %v479_v23, %v623_v36  ;;  %v644_v43 = vmul.f32 0.2, %v564_v31  ;;  %vm594_vm2 = vcmp.ge.f32.partialorder %v492_v32, 0.0 }
 0x110   : > { %v1059_v44 = vpack.c.bf16 %v655_v42, %v654_v18  ;;  %v671_v45 = vsel %vm607_vm15, %v543_v25, %v639_v39  ;;  %v626_v46 = vmul.f32 0.2, %v492_v32  ;;  %v556_v47 = vadd.f32 %v1392_v24, %v555_v28 }
 0x111   : > { %v1099_v48 = vpack.c.bf16 %v671_v45, %v670_v41  ;;  %v660_v49 = vsel %vm596_vm0, %v500_v26, %v628_v40  ;;  %v676_v50 = vsel %vm612_vm1, %v564_v31, %v644_v43  ;;  %v503_v51 = vadd.f32 %v1192_v33, %v1392_v24 }
 0x112   : > { %1127 = vst [vmem:[%s1409_s17 + $0x10] sm:$0xff] %v1059_v44   ;;  %vm610_vm3 = vcmp.ge.f32.partialorder %v556_v47, 0.0  ;;  %v642_v52 = vmul.f32 0.2, %v556_v47  ;;  %v567_v53 = vadd.f32 %v1208_v34, %v1392_v24  ;;  %v495_v54 = vadd.f32 %v1392_v24, %v494_v37  ;;  %v1195_v55 = vpop.f32.mrb[12].mxu0  ;;  %v1211_v56 = vpop.f32.mrb[12].mxu1 }
 0x113   : > { %1135 = vst [vmem:[%s1409_s17 + $0x50] sm:$0xff] %v1099_v48   ;;  %vm597_vm4 = vcmp.ge.f32.partialorder %v503_v51, 0.0  ;;  %v629_v57 = vmul.f32 0.2, %v503_v51  ;;  %v559_v58 = vadd.f32 %v1392_v24, %v558_v38  ;;  %v516_v59 = vadd.f32 %v1195_v55, %v1392_v24  ;;  %v507_v60 = vpop.f32.mrb[13].mxu0  ;;  %v571_v61 = vpop.f32.mrb[13].mxu1 }
 0x114   : > { %v658_v62 = vsel %vm594_vm2, %v492_v32, %v626_v46  ;;  %vm613_vm5 = vcmp.ge.f32.partialorder %v567_v53, 0.0  ;;  %v645_v63 = vmul.f32 0.2, %v567_v53  ;;  %vm595_vm6 = vcmp.ge.f32.partialorder %v495_v54, 0.0  ;;  %v1196_v0 = vpop.f32.mrb[14].mxu0  ;;  %v1212_v1 = vpop.f32.mrb[14].mxu1 }
 0x115   : > { %v661_v2 = vsel %vm597_vm4, %v503_v51, %v629_v57  ;;  %v627_v3 = vmul.f32 0.2, %v495_v54  ;;  %vm611_vm7 = vcmp.ge.f32.partialorder %v559_v58, 0.0  ;;  %v643_v4 = vmul.f32 0.2, %v559_v58  ;;  %v510_v5 = vpop.f32.mrb[15].mxu0 }
 0x116   : > { %v674_v6 = vsel %vm610_vm3, %v556_v47, %v642_v52  ;;  %v1074_v7 = vpack.c.bf16 %v661_v2, %v660_v49  ;;  %v677_v8 = vsel %vm613_vm5, %v567_v53, %v645_v63  ;;  %v632_v9 = vmul.f32 0.2, %v516_v59  ;;  %v574_v10 = vpop.f32.mrb[15].mxu1 }
 0x117   : > { %v1114_v11 = vpack.c.bf16 %v677_v8, %v676_v50  ;;  %v659_v12 = vsel %vm595_vm6, %v495_v54, %v627_v3  ;;  %v675_v13 = vsel %vm611_vm7, %v559_v58, %v643_v4  ;;  %v580_v14 = vadd.f32 %v1211_v56, %v1392_v24 }
 0x118   : > { %1130 = vst [vmem:[%s1409_s17 + $0x28] sm:$0xff] %v1074_v7   ;;  %v1069_v15 = vpack.c.bf16 %v659_v12, %v658_v62  ;;  %v1109_v16 = vpack.c.bf16 %v675_v13, %v674_v6  ;;  %vm600_vm8 = vcmp.ge.f32.partialorder %v516_v59, 0.0  ;;  %v508_v17 = vadd.f32 %v1392_v24, %v507_v60 }
 0x119   : > { %1138 = vst [vmem:[%s1409_s17 + $0x68] sm:$0xff] %v1114_v11   ;;  %vm616_vm9 = vcmp.ge.f32.partialorder %v580_v14, 0.0  ;;  %v648_v18 = vmul.f32 0.2, %v580_v14  ;;  %v572_v19 = vadd.f32 %v1392_v24, %v571_v61  ;;  %v519_v20 = vadd.f32 %v1196_v0, %v1392_v24 }
 0x11a   : > { %1129 = vst [vmem:[%s1409_s17 + $0x20] sm:$0xff] %v1069_v15   ;;  %1137 = vst [vmem:[%s1409_s17 + $0x60] sm:$0xff] %v1109_v16   ;;  %v630_v21 = vmul.f32 0.2, %v508_v17  ;;  %v583_v22 = vadd.f32 %v1212_v1, %v1392_v24  ;;  %v511_v23 = vadd.f32 %v1392_v24, %v510_v5  ;;  %v664_v25 = vsel %vm600_vm8, %v516_v59, %v632_v9 }
 0x11b   : > { %vm598_vm10 = vcmp.ge.f32.partialorder %v508_v17, 0.0  ;;  %vm601_vm11 = vcmp.ge.f32.partialorder %v519_v20, 0.0  ;;  %v680_v26 = vsel %vm616_vm9, %v580_v14, %v648_v18  ;;  %v633_v27 = vmul.f32 0.2, %v519_v20 }
 0x11c   : > { %vm617_vm12 = vcmp.ge.f32.partialorder %v583_v22, 0.0  ;;  %v649_v28 = vmul.f32 0.2, %v583_v22  ;;  %vm614_vm13 = vcmp.ge.f32.partialorder %v572_v19, 0.0  ;;  %vm599_vm14 = vcmp.ge.f32.partialorder %v511_v23, 0.0 }
 0x11d   : > { %v631_v29 = vmul.f32 0.2, %v511_v23  ;;  %v575_v30 = vadd.f32 %v1392_v24, %v574_v10  ;;  %v662_v31 = vsel %vm598_vm10, %v508_v17, %v630_v21  ;;  %v646_v32 = vmul.f32 0.2, %v572_v19 }
 0x11e   : > { %v665_v33 = vsel %vm601_vm11, %v519_v20, %v633_v27  ;;  %v681_v34 = vsel %vm617_vm12, %v583_v22, %v649_v28 }
 0x11f   : > { %v1084_v35 = vpack.c.bf16 %v665_v33, %v664_v25  ;;  %v1124_v36 = vpack.c.bf16 %v681_v34, %v680_v26  ;;  %v663_v37 = vsel %vm599_vm14, %v511_v23, %v631_v29  ;;  %vm615_vm15 = vcmp.ge.f32.partialorder %v575_v30, 0.0 }
 0x120   : > { %v1079_v38 = vpack.c.bf16 %v663_v37, %v662_v31  ;;  %v647_v39 = vmul.f32 0.2, %v575_v30  ;;  %v678_v40 = vsel %vm614_vm13, %v572_v19, %v646_v32 }
 0x121   : > { %1132 = vst [vmem:[%s1409_s17 + $0x38] sm:$0xff] %v1084_v35   ;;  %1140 = vst [vmem:[%s1409_s17 + $0x78] sm:$0xff] %v1124_v36  }
 0x122   : > { %1131 = vst [vmem:[%s1409_s17 + $0x30] sm:$0xff] %v1079_v38   ;;  %v679_v41 = vsel %vm615_vm15, %v575_v30, %v647_v39 }
 0x123   : > { %v1119_v42 = vpack.c.bf16 %v679_v41, %v678_v40 }
 0x125   : > { %1139 = vst [vmem:[%s1409_s17 + $0x70] sm:$0xff] %v1119_v42  }
 0x126 PF: > { %s13_s14 = sadd.s32 1, %s1299_s14   ;;  %s1468_s12 = smov %s1295_s13 }
 0x127   : > { %p10_p5 = scmp.ge.s32.totalorder %s13_s14, 4   ;;  %s1469_s13 = smov %s1471_s15 }
 0x129   :  { %12 = sbr.rel (!%p10_p5) target bundleno = 2 (0x2), region = 68 }

// kernel: _lambda_.6
= control target key start
LH: loop header
LB: loop body
LE: loop exit
PB: predicated region body
PF: predicated region fallthrough
CT: control target
= control target key end

     0   :  { %s757_s12 = smov 0   ;;  %s759_s13 = smov 0   ;;  %s832_s0 = inlined_call_operand.vmem [shape: bf16[128,128], index: 0, kind: input, shape index: {}]   ;;  %s833_s1 = inlined_call_operand.vmem [shape: bf16[128,128], index: 1, kind: input, shape index: {}]   ;;  %s834_s2 = inlined_call_operand.vmem [shape: f32[1,128], index: 2, kind: input, shape index: {}]   ;;  %s835_s3 = inlined_call_operand.vmem [shape: bf16[128,128], index: 3, kind: output, shape index: {}]  }
   0x1   :  { %s761_s14 = smov 0  }
   0x2 LB: > { %s25_s15 = sadd.s32 1, %s731_s13  ;;  %p566_p0 = scmp.ge.s32.totalorder %s735_s14, 1  ;;  %s735_s14 = sphi %s761_s14, %s13_s14   ;;  %s731_s13 = sphi %s759_s13, %s837_s13   ;;  %s727_s12 = sphi %s757_s12, %s836_s12  }
   0x3   : > { %p27_p1 = scmp.ge.s32.totalorder %s25_s15, 2  ;;  %p169_p2 = scmp.lt.s32.totalorder %s735_s14, 3 }
   0x5   : > { %s839_s15 = smov (%p27_p1, %s25_s15), 0  ;;  %p170_p3 = pnand %p566_p0, %p169_p2 }
   0x6   : > { %v701_v0 = vld [vmem:[%s833_s1] sm:$0xff] (!%p170_p3)   ;;  %s567_s18 = sshll.u32 (!%p170_p3), %s727_s12, 3  ;;  %v702_v1 = vld [vmem:[%s833_s1 + $0x8] sm:$0xff] (!%p170_p3)   ;;  %v703_v2 = vld [vmem:[%s833_s1 + $0x10] sm:$0xff] (!%p170_p3)  }
   0x7   : > { %173 = sbr.rel (%p170_p3) target bundleno = 264 (0x108), region = 32  ;;  %p204_p4 = scmp.lt.s32.totalorder (!%p170_p3), %s567_s18, 15  ;;  %637 = vmatprep.subr.bf16.mxu0 (!%p170_p3), %v701_v0  ;;  %661 = vmatprep.subr.bf16.mxu1 (!%p170_p3), %v701_v0  ;;  %v704_v3 = vld [vmem:[%s833_s1 + $0x18] sm:$0xff] (!%p170_p3)   ;;  %v705_v6 = vld [vmem:[%s833_s1 + $0x20] sm:$0xff] (!%p170_p3)   ;;  %v706_v7 = vld [vmem:[%s833_s1 + $0x28] sm:$0xff] (!%p170_p3)  }
   0x8   : > { %638 = vmatpush3.bf16.msra.mxu0 (!%p170_p3), %v701_v0  ;;  %669 = vmatpush3.bf16.msra.mxu1 (!%p170_p3), %v701_v0  ;;  %v707_v8 = vld [vmem:[%s833_s1 + $0x30] sm:$0xff] (!%p170_p3)   ;;  %v708_v9 = vld [vmem:[%s833_s1 + $0x38] sm:$0xff] (!%p170_p3)   ;;  %v571_v12 = vld [vmem:[%s834_s2] ss:$0 sm:$0xff] (!%p170_p3) }
   0x9   : > { %639 = vmatprep.subr.bf16.mxu0 (!%p170_p3), %v702_v1  ;;  %662 = vmatprep.subr.bf16.mxu1 (!%p170_p3), %v702_v1 }
   0xc   : > { %640 = vmatpush3.bf16.msra.mxu0 (!%p170_p3), %v702_v1  ;;  %670 = vmatpush3.bf16.msra.mxu1 (!%p170_p3), %v702_v1 }
   0xd   : > { %641 = vmatprep.subr.bf16.mxu0 (!%p170_p3), %v703_v2  ;;  %663 = vmatprep.subr.bf16.mxu1 (!%p170_p3), %v703_v2 }
   0xe   : > { %s841_s18 = smov (!%p204_p4, %s567_s18), 15 }
   0xf   : > { %s568_s23 = sshll.u32 %s841_s18, 2 }
  0x10   : > { %s792_s26 = scalar_lea.vmem %s832_s0, %s568_s23  ;;  %642 = vmatpush3.bf16.msra.mxu0 %v703_v2  ;;  %671 = vmatpush3.bf16.msra.mxu1 %v703_v2  ;;  %s223_s17 = scalar_lea.vmem %s835_s3, %s568_s23 }
  0x11   : > { %v709_v4 = vld [vmem:[%s792_s26] sm:$0xff]   ;;  %v710_v5 = vld [vmem:[%s792_s26 + $0x10] sm:$0xff]   ;;  %643 = vmatprep.subr.bf16.mxu0 %v704_v3  ;;  %664 = vmatprep.subr.bf16.mxu1 %v704_v3  ;;  %v711_v10 = vld [vmem:[%s792_s26 + $0x8] sm:$0xff]  }
  0x12   : > { %653 = vmatprep.mubr.bf16.mxu0 %v709_v4  ;;  %657 = vmatprep.mubr.bf16.mxu1 %v710_v5  ;;  %v712_v11 = vld [vmem:[%s792_s26 + $0x18] sm:$0xff]  }
  0x14   : > { %644 = vmatpush3.bf16.msra.mxu0 %v704_v3  ;;  %672 = vmatpush3.bf16.msra.mxu1 %v704_v3 }
  0x15   : > { %645 = vmatprep.subr.bf16.mxu0 %v705_v6  ;;  %665 = vmatprep.subr.bf16.mxu1 %v705_v6 }
  0x18   : > { %646 = vmatpush3.bf16.msra.mxu0 %v705_v6  ;;  %673 = vmatpush3.bf16.msra.mxu1 %v705_v6 }
  0x19   : > { %647 = vmatprep.subr.bf16.mxu0 %v706_v7  ;;  %666 = vmatprep.subr.bf16.mxu1 %v706_v7 }
  0x1c   : > { %648 = vmatpush3.bf16.msra.mxu0 %v706_v7  ;;  %674 = vmatpush3.bf16.msra.mxu1 %v706_v7 }
  0x1d   : > { %649 = vmatprep.subr.bf16.mxu0 %v707_v8  ;;  %667 = vmatprep.subr.bf16.mxu1 %v707_v8 }
  0x20   : > { %650 = vmatpush3.bf16.msra.mxu0 %v707_v8  ;;  %675 = vmatpush3.bf16.msra.mxu1 %v707_v8 }
  0x21   : > { %651 = vmatprep.subr.bf16.mxu0 %v708_v9  ;;  %668 = vmatprep.subr.bf16.mxu1 %v708_v9 }
  0x24   : > { %652 = vmatpush3.bf16.msra.mxu0 %v708_v9  ;;  %676 = vmatpush3.bf16.msra.mxu1 %v708_v9 }
  0x27   : > { %654 = vmatmul.mubr.bf16.vlgmr.msra.gmra.mrb[0].mxu0 %v711_v10  ;;  %658 = vmatmul.mubr.bf16.vlgmr.msra.gmra.mrb[0].mxu1 %v712_v11 }
  0xfa   : > { %v655_v13 = vpop.f32.mrb[0].mxu0  ;;  %v659_v14 = vpop.f32.mrb[0].mxu1 }
  0xfb   : > { %v372_v15 = vadd.f32 %v655_v13, %v571_v12  ;;  %v388_v16 = vadd.f32 %v659_v14, %v571_v12  ;;  %v363_v17 = vpop.f32.mrb[1].mxu0  ;;  %v379_v18 = vpop.f32.mrb[1].mxu1 }
  0xfc   : > { %v364_v19 = vadd.f32 %v571_v12, %v363_v17  ;;  %v380_v20 = vadd.f32 %v571_v12, %v379_v18  ;;  %v656_v21 = vpop.f32.mrb[2].mxu0  ;;  %v660_v22 = vpop.f32.mrb[2].mxu1 }
  0xfd   : > { %vm396_vm0 = vcmp.ge.f32.partialorder %v372_v15, 0.0  ;;  %v404_v23 = vmul.f32 0.2, %v372_v15  ;;  %vm400_vm1 = vcmp.ge.f32.partialorder %v388_v16, 0.0  ;;  %v408_v24 = vmul.f32 0.2, %v388_v16 }
  0xfe   : > { %vm394_vm2 = vcmp.ge.f32.partialorder %v364_v19, 0.0  ;;  %v402_v25 = vmul.f32 0.2, %v364_v19  ;;  %vm398_vm3 = vcmp.ge.f32.partialorder %v380_v20, 0.0  ;;  %v406_v26 = vmul.f32 0.2, %v380_v20 }
  0xff   : > { %v375_v27 = vadd.f32 %v656_v21, %v571_v12  ;;  %v391_v28 = vadd.f32 %v660_v22, %v571_v12  ;;  %v366_v29 = vpop.f32.mrb[3].mxu0  ;;  %v382_v30 = vpop.f32.mrb[3].mxu1  ;;  %v412_v31 = vsel %vm396_vm0, %v372_v15, %v404_v23  ;;  %v416_v32 = vsel %vm400_vm1, %v388_v16, %v408_v24 }
 0x100   : > { %v367_v33 = vadd.f32 %v571_v12, %v366_v29  ;;  %v383_v34 = vadd.f32 %v571_v12, %v382_v30  ;;  %v410_v39 = vsel %vm394_vm2, %v364_v19, %v402_v25  ;;  %v414_v40 = vsel %vm398_vm3, %v380_v20, %v406_v26 }
 0x101   : > { %vm397_vm4 = vcmp.ge.f32.partialorder %v375_v27, 0.0  ;;  %v405_v35 = vmul.f32 0.2, %v375_v27  ;;  %vm401_vm5 = vcmp.ge.f32.partialorder %v391_v28, 0.0  ;;  %v409_v36 = vmul.f32 0.2, %v391_v28 }
 0x102   : > { %vm395_vm6 = vcmp.ge.f32.partialorder %v367_v33, 0.0  ;;  %v403_v37 = vmul.f32 0.2, %v367_v33  ;;  %vm399_vm7 = vcmp.ge.f32.partialorder %v383_v34, 0.0  ;;  %v407_v38 = vmul.f32 0.2, %v383_v34 }
 0x103   : > { %v413_v41 = vsel %vm397_vm4, %v375_v27, %v405_v35  ;;  %v417_v42 = vsel %vm401_vm5, %v391_v28, %v409_v36 }
 0x104   : > { %v610_v43 = vpack.c.bf16 %v413_v41, %v412_v31  ;;  %v620_v44 = vpack.c.bf16 %v417_v42, %v416_v32  ;;  %v411_v45 = vsel %vm395_vm6, %v367_v33, %v403_v37  ;;  %v415_v46 = vsel %vm399_vm7, %v383_v34, %v407_v38 }
 0x105   : > { %v605_v47 = vpack.c.bf16 %v411_v45, %v410_v39  ;;  %v615_v48 = vpack.c.bf16 %v415_v46, %v414_v40 }
 0x106   : > { %622 = vst [vmem:[%s223_s17 + $0x8] sm:$0xff] %v610_v43   ;;  %624 = vst [vmem:[%s223_s17 + $0x18] sm:$0xff] %v620_v44  }
 0x107   : > { %606 = vst [vmem:[%s223_s17] sm:$0xff] %v605_v47   ;;  %623 = vst [vmem:[%s223_s17 + $0x10] sm:$0xff] %v615_v48  }
 0x108 PF: > { %s13_s14 = sadd.s32 1, %s735_s14   ;;  %s836_s12 = smov %s731_s13 }
 0x109   : > { %p10_p5 = scmp.ge.s32.totalorder %s13_s14, 4   ;;  %s837_s13 = smov %s839_s15 }
 0x10b   :  { %12 = sbr.rel (!%p10_p5) target bundleno = 2 (0x2), region = 68 }

// kernel: _lambda_.7
= control target key start
LH: loop header
LB: loop body
LE: loop exit
PB: predicated region body
PF: predicated region fallthrough
CT: control target
= control target key end

     0   :  { %s687_s12 = smov 0   ;;  %s689_s13 = smov 0   ;;  %s775_s0 = inlined_call_operand.vmem [shape: bf16[32,256], index: 0, kind: input, shape index: {}]   ;;  %s776_s1 = inlined_call_operand.vmem [shape: bf16[256,128], index: 1, kind: input, shape index: {}]   ;;  %s777_s2 = inlined_call_operand.vmem [shape: f32[1,128], index: 2, kind: input, shape index: {}]   ;;  %s778_s3 = inlined_call_operand.vmem [shape: bf16[32,128], index: 3, kind: output, shape index: {}]  }
   0x1   :  { %s691_s14 = smov 0  }
   0x2 LB: > { %s25_s15 = sadd.s32 1, %s661_s13  ;;  %p541_p0 = scmp.ge.s32.totalorder %s665_s14, 1  ;;  %s665_s14 = sphi %s691_s14, %s13_s14   ;;  %s661_s13 = sphi %s689_s13, %s780_s13   ;;  %s657_s12 = sphi %s687_s12, %s779_s12  }
   0x3   : > { %p27_p1 = scmp.ge.s32.totalorder %s25_s15, 2  ;;  %p170_p2 = scmp.lt.s32.totalorder %s665_s14, 3 }
   0x5   : > { %s782_s15 = smov (%p27_p1, %s25_s15), 0  ;;  %p171_p3 = pnand %p541_p0, %p170_p2 }
   0x6   : > { %v624_v0 = vld [vmem:[%s776_s1 + $0x40] sm:$0xff] (!%p171_p3)   ;;  %s542_s18 = sshll.u32 (!%p171_p3), %s657_s12, 1  ;;  %v626_v2 = vld [vmem:[%s776_s1 + $0x48] sm:$0xff] (!%p171_p3)   ;;  %v628_v4 = vld [vmem:[%s776_s1 + $0x50] sm:$0xff] (!%p171_p3)  }
   0x7   : > { %174 = sbr.rel (%p171_p3) target bundleno = 264 (0x108), region = 32  ;;  %v625_v1 = vld [vmem:[%s776_s1] sm:$0xff] (!%p171_p3)   ;;  %578 = vmatprep.subr.bf16.mxu0 (!%p171_p3), %v624_v0  ;;  %v627_v3 = vld [vmem:[%s776_s1 + $0x8] sm:$0xff] (!%p171_p3)   ;;  %p206_p4 = scmp.lt.s32.totalorder (!%p171_p3), %s542_s18, 3  ;;  %v629_v5 = vld [vmem:[%s776_s1 + $0x10] sm:$0xff] (!%p171_p3)  }
   0x8   : > { %579 = vmatpush3.bf16.msra.mxu0 (!%p171_p3), %v625_v1  ;;  %v630_v6 = vld [vmem:[%s776_s1 + $0x58] sm:$0xff] (!%p171_p3)   ;;  %v632_v8 = vld [vmem:[%s776_s1 + $0x60] sm:$0xff] (!%p171_p3)   ;;  %v634_v10 = vld [vmem:[%s776_s1 + $0x68] sm:$0xff] (!%p171_p3)  }
   0x9   : > { %580 = vmatprep.subr.bf16.mxu0 (!%p171_p3), %v626_v2  ;;  %v631_v7 = vld [vmem:[%s776_s1 + $0x18] sm:$0xff] (!%p171_p3)   ;;  %v633_v9 = vld [vmem:[%s776_s1 + $0x20] sm:$0xff] (!%p171_p3)   ;;  %v635_v12 = vld [vmem:[%s776_s1 + $0x28] sm:$0xff] (!%p171_p3)  }
   0xa   : > { %v636_v13 = vld [vmem:[%s776_s1 + $0x70] sm:$0xff] (!%p171_p3)   ;;  %v638_v15 = vld [vmem:[%s776_s1 + $0x78] sm:$0xff] (!%p171_p3)   ;;  %v547_v19 = vld [vmem:[%s777_s2] ss:$0 sm:$0xff] (!%p171_p3) }
   0xb   : > { %v637_v14 = vld [vmem:[%s776_s1 + $0x30] sm:$0xff] (!%p171_p3)   ;;  %v639_v16 = vld [vmem:[%s776_s1 + $0x38] sm:$0xff] (!%p171_p3)  }
   0xc   : > { %581 = vmatpush3.bf16.msra.mxu0 (!%p171_p3), %v627_v3 }
   0xd   : > { %582 = vmatprep.subr.bf16.mxu0 (!%p171_p3), %v628_v4 }
   0xe   : > { %s784_s18 = smov (!%p206_p4, %s542_s18), 3 }
   0xf   : > { %s570_s6 = sshll.u32 %s784_s18, 3  ;;  %s546_s5 = sshll.u32 %s784_s18, 2 }
  0x10   : > { %583 = vmatpush3.bf16.msra.mxu0 %v629_v5  ;;  %s210_s11 = scalar_lea.vmem %s775_s0, %s570_s6  ;;  %s226_s8 = scalar_lea.vmem %s778_s3, %s546_s5 }
  0x11   : > { %584 = vmatprep.subr.bf16.mxu0 %v630_v6  ;;  %v642_v11 = vld [vmem:[%s210_s11 + $0x4] ss:$8 sps:$4 sm:$0xff]   ;;  %v640_v17 = vld [vmem:[%s210_s11] ss:$8 sps:$4 sm:$0xff]  }
  0x12   : > { %408 = vmatprep.mubr.bf16.mxu0 %v642_v11 }
  0x14   : > { %585 = vmatpush3.bf16.msra.mxu0 %v631_v7 }
  0x15   : > { %586 = vmatprep.subr.bf16.mxu0 %v632_v8 }
  0x18   : > { %587 = vmatpush3.bf16.msra.mxu0 %v633_v9 }
  0x19   : > { %588 = vmatprep.subr.bf16.mxu0 %v634_v10 }
  0x1c   : > { %589 = vmatpush3.bf16.msra.mxu0 %v635_v12 }
  0x1d   : > { %590 = vmatprep.subr.bf16.mxu0 %v636_v13 }
  0x20   : > { %591 = vmatpush3.bf16.msra.mxu0 %v637_v14 }
  0x21   : > { %592 = vmatprep.subr.bf16.mxu0 %v638_v15 }
  0x24   : > { %593 = vmatpush3.bf16.msra.mxu0 %v639_v16 }
  0x27   : > { %409 = vmatmul.mubr.bf16.vlgmr.msra.gmra.mrb[0].mxu0 %v640_v17 }
  0xfa   : > { %v594_v18 = vpop.f32.mrb[0].mxu0 }
  0xfb   : > { %v595_v20 = vpop.f32.mrb[1].mxu0 }
  0xfc   : > { %v596_v21 = vadd.f32 %v595_v20, %v594_v18  ;;  %v597_v22 = vpop.f32.mrb[2].mxu0 }
  0xfd   : > { %v598_v23 = vpop.f32.mrb[3].mxu0 }
  0xfe   : > { %v411_v24 = vadd.f32 %v596_v21, %v547_v19  ;;  %v599_v25 = vadd.f32 %v598_v23, %v597_v22 }
 0x100   : > { %v419_v26 = vmul.f32 0.2, %v411_v24  ;;  %v414_v27 = vadd.f32 %v599_v25, %v547_v19  ;;  %vm417_vm0 = vcmp.ge.f32.partialorder %v411_v24, 0.0 }
 0x102   : > { %vm418_vm1 = vcmp.ge.f32.partialorder %v414_v27, 0.0  ;;  %v420_v28 = vmul.f32 0.2, %v414_v27  ;;  %v421_v29 = vsel %vm417_vm0, %v411_v24, %v419_v26 }
 0x104   : > { %v422_v30 = vsel %vm418_vm1, %v414_v27, %v420_v28 }
 0x105   : > { %v576_v31 = vpack.c.bf16 %v422_v30, %v421_v29 }
 0x107   : > { %577 = vst [vmem:[%s226_s8] sm:$0xff] %v576_v31  }
 0x108 PF: > { %s13_s14 = sadd.s32 1, %s665_s14   ;;  %s779_s12 = smov %s661_s13 }
 0x109   : > { %p10_p5 = scmp.ge.s32.totalorder %s13_s14, 4   ;;  %s780_s13 = smov %s782_s15 }
 0x10b   :  { %12 = sbr.rel (!%p10_p5) target bundleno = 2 (0x2), region = 68 }

// kernel: _lambda_.8
= control target key start
LH: loop header
LB: loop body
LE: loop exit
PB: predicated region body
PF: predicated region fallthrough
CT: control target
= control target key end

     0   :  { %s927_s12 = smov 0   ;;  %s929_s13 = smov 0   ;;  %s1066_s0 = inlined_call_operand.vmem [shape: bf16[32,512], index: 0, kind: input, shape index: {}]   ;;  %s1067_s1 = inlined_call_operand.vmem [shape: bf16[512,128], index: 1, kind: input, shape index: {}]   ;;  %s1068_s2 = inlined_call_operand.vmem [shape: f32[1,128], index: 2, kind: input, shape index: {}]   ;;  %s1069_s3 = inlined_call_operand.vmem [shape: bf16[32,128], index: 3, kind: output, shape index: {}]  }
   0x1   :  { %s931_s14 = smov 0  }
   0x2 LB: > { %s25_s15 = sadd.s32 1, %s901_s13  ;;  %p722_p0 = scmp.ge.s32.totalorder %s905_s14, 1  ;;  %s905_s14 = sphi %s931_s14, %s13_s14   ;;  %s901_s13 = sphi %s929_s13, %s1071_s13   ;;  %s897_s12 = sphi %s927_s12, %s1070_s12  }
   0x3   : > { %p27_p1 = scmp.ge.s32.totalorder %s25_s15, 2  ;;  %p170_p2 = scmp.lt.s32.totalorder %s905_s14, 3 }
   0x5   : > { %s1073_s15 = smov (%p27_p1, %s25_s15), 0  ;;  %p171_p3 = pnand %p722_p0, %p170_p2 }
   0x6   : > { %v845_v0 = vld [vmem:[%s1067_s1 + $0x40] sm:$0xff] (!%p171_p3)   ;;  %v849_v4 = vld [vmem:[%s1067_s1 + $0x48] sm:$0xff] (!%p171_p3)   ;;  %v853_v8 = vld [vmem:[%s1067_s1 + $0x50] sm:$0xff] (!%p171_p3)   ;;  %s723_s25 = sshll.u32 (!%p171_p3), %s897_s12, 1 }
   0x7   : > { %174 = sbr.rel (%p171_p3) target bundleno = 267 (0x10b), region = 32  ;;  %v846_v1 = vld [vmem:[%s1067_s1 + $0xc0] sm:$0xff] (!%p171_p3)   ;;  %777 = vmatprep.subr.bf16.mxu0 (!%p171_p3), %v845_v0  ;;  %v850_v5 = vld [vmem:[%s1067_s1 + $0xc8] sm:$0xff] (!%p171_p3)   ;;  %v854_v9 = vld [vmem:[%s1067_s1 + $0xd0] sm:$0xff] (!%p171_p3)   ;;  %p206_p4 = scmp.lt.s32.totalorder (!%p171_p3), %s723_s25, 3 }
   0x8   : > { %v847_v2 = vld [vmem:[%s1067_s1] sm:$0xff] (!%p171_p3)   ;;  %799 = vmatprep.subr.bf16.mxu1 (!%p171_p3), %v846_v1  ;;  %v851_v6 = vld [vmem:[%s1067_s1 + $0x8] sm:$0xff] (!%p171_p3)   ;;  %v855_v10 = vld [vmem:[%s1067_s1 + $0x10] sm:$0xff] (!%p171_p3)  }
   0x9   : > { %v848_v3 = vld [vmem:[%s1067_s1 + $0x80] sm:$0xff] (!%p171_p3)   ;;  %778 = vmatpush3.bf16.msra.mxu0 (!%p171_p3), %v847_v2  ;;  %v852_v7 = vld [vmem:[%s1067_s1 + $0x88] sm:$0xff] (!%p171_p3)   ;;  %v856_v11 = vld [vmem:[%s1067_s1 + $0x90] sm:$0xff] (!%p171_p3)  }
   0xa   : > { %800 = vmatpush3.bf16.msra.mxu1 (!%p171_p3), %v848_v3  ;;  %779 = vmatprep.subr.bf16.mxu0 (!%p171_p3), %v849_v4  ;;  %v857_v12 = vld [vmem:[%s1067_s1 + $0x58] sm:$0xff] (!%p171_p3)   ;;  %v861_v16 = vld [vmem:[%s1067_s1 + $0x60] sm:$0xff] (!%p171_p3)   ;;  %v865_v20 = vld [vmem:[%s1067_s1 + $0x68] sm:$0xff] (!%p171_p3)  }
   0xb   : > { %801 = vmatprep.subr.bf16.mxu1 (!%p171_p3), %v850_v5  ;;  %v858_v13 = vld [vmem:[%s1067_s1 + $0xd8] sm:$0xff] (!%p171_p3)   ;;  %v862_v17 = vld [vmem:[%s1067_s1 + $0xe0] sm:$0xff] (!%p171_p3)   ;;  %v866_v21 = vld [vmem:[%s1067_s1 + $0xe8] sm:$0xff] (!%p171_p3)  }
   0xc   : > { %v859_v14 = vld [vmem:[%s1067_s1 + $0x18] sm:$0xff] (!%p171_p3)   ;;  %v863_v18 = vld [vmem:[%s1067_s1 + $0x20] sm:$0xff] (!%p171_p3)   ;;  %v867_v22 = vld [vmem:[%s1067_s1 + $0x28] sm:$0xff] (!%p171_p3)  }
   0xd   : > { %780 = vmatpush3.bf16.msra.mxu0 (!%p171_p3), %v851_v6  ;;  %v860_v15 = vld [vmem:[%s1067_s1 + $0x98] sm:$0xff] (!%p171_p3)   ;;  %v864_v19 = vld [vmem:[%s1067_s1 + $0xa0] sm:$0xff] (!%p171_p3)   ;;  %v868_v23 = vld [vmem:[%s1067_s1 + $0xa8] sm:$0xff] (!%p171_p3)  }
   0xe   : > { %802 = vmatpush3.bf16.msra.mxu1 %v852_v7  ;;  %781 = vmatprep.subr.bf16.mxu0 %v853_v8  ;;  %s1075_s25 = smov (!%p206_p4, %s723_s25), 3  ;;  %v869_v24 = vld [vmem:[%s1067_s1 + $0x70] sm:$0xff]   ;;  %v873_v28 = vld [vmem:[%s1067_s1 + $0x78] sm:$0xff]   ;;  %v728_v38 = vld [vmem:[%s1068_s2] ss:$0 sm:$0xff] }
   0xf   : > { %803 = vmatprep.subr.bf16.mxu1 %v854_v9  ;;  %v870_v25 = vld [vmem:[%s1067_s1 + $0xf0] sm:$0xff]   ;;  %s769_s24 = sshll.u32 %s1075_s25, 4  ;;  %v874_v29 = vld [vmem:[%s1067_s1 + $0xf8] sm:$0xff]   ;;  %s727_s17 = sshll.u32 %s1075_s25, 2 }
  0x10   : > { %v871_v26 = vld [vmem:[%s1067_s1 + $0x30] sm:$0xff]   ;;  %s210_s12 = scalar_lea.vmem %s1066_s0, %s769_s24  ;;  %v875_v30 = vld [vmem:[%s1067_s1 + $0x38] sm:$0xff]   ;;  %s226_s20 = scalar_lea.vmem %s1069_s3, %s727_s17 }
  0x11   : > { %782 = vmatpush3.bf16.msra.mxu0 %v855_v10  ;;  %v872_v27 = vld [vmem:[%s1067_s1 + $0xb0] sm:$0xff]   ;;  %v876_v31 = vld [vmem:[%s1067_s1 + $0xb8] sm:$0xff]  }
  0x12   : > { %804 = vmatpush3.bf16.msra.mxu1 %v856_v11  ;;  %783 = vmatprep.subr.bf16.mxu0 %v857_v12  ;;  %v877_v32 = vld [vmem:[%s210_s12] ss:$16 sps:$4 sm:$0xff]   ;;  %v879_v33 = vld [vmem:[%s210_s12 + $0x4] ss:$16 sps:$4 sm:$0xff]   ;;  %v880_v34 = vld [vmem:[%s210_s12 + $0x8] ss:$16 sps:$4 sm:$0xff]  }
  0x13   : > { %805 = vmatprep.subr.bf16.mxu1 %v858_v13  ;;  %v882_v35 = vld [vmem:[%s210_s12 + $0xc] ss:$16 sps:$4 sm:$0xff]   ;;  %548 = vmatprep.mubr.bf16.mxu0 %v879_v33 }
  0x14   : > { %589 = vmatprep.mubr.bf16.mxu1 %v882_v35 }
  0x15   : > { %784 = vmatpush3.bf16.msra.mxu0 %v859_v14 }
  0x16   : > { %806 = vmatpush3.bf16.msra.mxu1 %v860_v15  ;;  %785 = vmatprep.subr.bf16.mxu0 %v861_v16 }
  0x17   : > { %807 = vmatprep.subr.bf16.mxu1 %v862_v17 }
  0x19   : > { %786 = vmatpush3.bf16.msra.mxu0 %v863_v18 }
  0x1a   : > { %808 = vmatpush3.bf16.msra.mxu1 %v864_v19  ;;  %787 = vmatprep.subr.bf16.mxu0 %v865_v20 }
  0x1b   : > { %809 = vmatprep.subr.bf16.mxu1 %v866_v21 }
  0x1d   : > { %788 = vmatpush3.bf16.msra.mxu0 %v867_v22 }
  0x1e   : > { %810 = vmatpush3.bf16.msra.mxu1 %v868_v23  ;;  %789 = vmatprep.subr.bf16.mxu0 %v869_v24 }
  0x1f   : > { %811 = vmatprep.subr.bf16.mxu1 %v870_v25 }
  0x21   : > { %790 = vmatpush3.bf16.msra.mxu0 %v871_v26 }
  0x22   : > { %812 = vmatpush3.bf16.msra.mxu1 %v872_v27  ;;  %791 = vmatprep.subr.bf16.mxu0 %v873_v28 }
  0x23   : > { %813 = vmatprep.subr.bf16.mxu1 %v874_v29 }
  0x25   : > { %792 = vmatpush3.bf16.msra.mxu0 %v875_v30 }
  0x26   : > { %814 = vmatpush3.bf16.msra.mxu1 %v876_v31 }
  0x28   : > { %549 = vmatmul.mubr.bf16.vlgmr.msra.gmra.mrb[0].mxu0 %v877_v32 }
  0x29   : > { %590 = vmatmul.mubr.bf16.vlgmr.msra.gmra.mrb[0].mxu1 %v880_v34 }
  0xfb   : > { %v793_v36 = vpop.f32.mrb[0].mxu0 }
  0xfc   : > { %v815_v37 = vpop.f32.mrb[0].mxu1  ;;  %v794_v39 = vpop.f32.mrb[1].mxu0 }
  0xfd   : > { %v795_v40 = vadd.f32 %v794_v39, %v793_v36  ;;  %v816_v41 = vpop.f32.mrb[1].mxu1  ;;  %v796_v42 = vpop.f32.mrb[2].mxu0 }
  0xfe   : > { %v817_v43 = vadd.f32 %v816_v41, %v815_v37  ;;  %v818_v44 = vpop.f32.mrb[2].mxu1  ;;  %v797_v45 = vpop.f32.mrb[3].mxu0 }
  0xff   : > { %v551_v46 = vadd.f32 %v795_v40, %v728_v38  ;;  %v798_v47 = vadd.f32 %v797_v45, %v796_v42  ;;  %v819_v48 = vpop.f32.mrb[3].mxu1 }
 0x100   : > { %v820_v49 = vadd.f32 %v819_v48, %v818_v44 }
 0x101   : > { %v592_v50 = vadd.f32 %v817_v43, %v551_v46  ;;  %v554_v51 = vadd.f32 %v798_v47, %v728_v38 }
 0x103   : > { %v600_v52 = vmul.f32 0.2, %v592_v50  ;;  %v595_v53 = vadd.f32 %v820_v49, %v554_v51  ;;  %vm598_vm0 = vcmp.ge.f32.partialorder %v592_v50, 0.0 }
 0x105   : > { %vm599_vm1 = vcmp.ge.f32.partialorder %v595_v53, 0.0  ;;  %v601_v54 = vmul.f32 0.2, %v595_v53  ;;  %v602_v55 = vsel %vm598_vm0, %v592_v50, %v600_v52 }
 0x107   : > { %v603_v56 = vsel %vm599_vm1, %v595_v53, %v601_v54 }
 0x108   : > { %v775_v57 = vpack.c.bf16 %v603_v56, %v602_v55 }
 0x10a   : > { %776 = vst [vmem:[%s226_s20] sm:$0xff] %v775_v57  }
 0x10b PF: > { %s13_s14 = sadd.s32 1, %s905_s14   ;;  %s1070_s12 = smov %s901_s13 }
 0x10c   : > { %p10_p5 = scmp.ge.s32.totalorder %s13_s14, 4   ;;  %s1071_s13 = smov %s1073_s15 }
 0x10e   :  { %12 = sbr.rel (!%p10_p5) target bundleno = 2 (0x2), region = 68 }

// kernel: _lambda_.9
= control target key start
LH: loop header
LB: loop body
LE: loop exit
PB: predicated region body
PF: predicated region fallthrough
CT: control target
= control target key end

     0   :  { %v45_v0 = vlaneseq  ;;  %vm160_vm0 = vcmask 7168   ;;  %s224_s0 = inlined_call_operand.vmem [shape: bf16[16,1024], index: 0, kind: input, shape index: {}]   ;;  %s225_s1 = inlined_call_operand.vmem [shape: bf16[1,1024], index: 1, kind: input, shape index: {}]   ;;  %s226_s2 = inlined_call_operand.<no memory space> [shape: f32[1,1], index: 2, kind: input, shape index: {}]   ;;  %s227_s3 = inlined_call_operand.vmem [shape: f32[16,1], index: 3, kind: output, shape index: {}]  }
   0x1   :  { %v8_v1 = vstv %s226_s2  ;;  %v16_v2 = vld [vmem:[%s224_s0] sm:$0xff]  ;;  %v17_v4 = vld [vmem:[%s224_s0 + $0x8] sm:$0xff]  ;;  %v18_v19 = vld [vmem:[%s224_s0 + $0x10] sm:$0xff] }
   0x2   :  { %v40_v3 = vld [vmem:[%s225_s1] sm:$0xff]  ;;  %9 = vst [vmem:[#allocation2] sm:$0x1] %v8_v1  ;;  %v46_v6 = vshrl.u32 %v45_v0, 7  ;;  %v24_v8 = vunpack.c.l.bf16 %v16_v2  ;;  %v21_v14 = vld [vmem:[%s224_s0 + $0x28] sm:$0xff]  ;;  %v25_v15 = vunpack.c.h.bf16 %v16_v2  ;;  %v26_v16 = vunpack.c.l.bf16 %v17_v4  ;;  %v22_v32 = vld [vmem:[%s224_s0 + $0x30] sm:$0xff] }
   0x3   :  { %v41_v5 = vunpack.c.l.bf16 %v40_v3  ;;  %v20_v7 = vld [vmem:[%s224_s0 + $0x20] sm:$0xff]  ;;  %v42_v9 = vunpack.c.h.bf16 %v40_v3  ;;  %v27_v17 = vunpack.c.h.bf16 %v17_v4  ;;  %v34_v27 = vunpack.c.l.bf16 %v21_v14  ;;  %v19_v37 = vld [vmem:[%s224_s0 + $0x18] sm:$0xff] }
   0x4   :  { %v47_v10 = vsub.s32 0, %v46_v6  ;;  %v51_v11 = vsub.s32 2, %v46_v6  ;;  %v55_v12 = vsub.s32 4, %v46_v6  ;;  %v59_v13 = vsub.s32 6, %v46_v6  ;;  %v23_v47 = vld [vmem:[%s224_s0 + $0x38] sm:$0xff] }
   0x5   :  { %v32_v18 = vunpack.c.l.bf16 %v20_v7  ;;  %v33_v26 = vunpack.c.h.bf16 %v20_v7  ;;  %v28_v33 = vunpack.c.l.bf16 %v18_v19  ;;  %v29_v34 = vunpack.c.h.bf16 %v18_v19 }
   0x6   :  { %v48_v20 = vrot.slane %v41_v5, %v47_v10  ;;  %v52_v21 = vrot.slane %v41_v5, %v51_v11  ;;  %v56_v22 = vrot.slane %v41_v5, %v55_v12  ;;  %v60_v23 = vrot.slane %v41_v5, %v59_v13 }
   0x7   :  { %v64_v24 = vrot.slane %v42_v9, %v47_v10  ;;  %v68_v25 = vrot.slane %v42_v9, %v51_v11  ;;  %v72_v35 = vrot.slane %v42_v9, %v55_v12  ;;  %v35_v36 = vunpack.c.h.bf16 %v21_v14 }
   0x8   :  { %v88_v28 = vrot.slane %v48_v20, %v47_v10  ;;  %v92_v29 = vrot.slane %v52_v21, %v47_v10  ;;  %v96_v30 = vrot.slane %v56_v22, %v47_v10  ;;  %v100_v31 = vrot.slane %v60_v23, %v47_v10 }
   0x9   :  { %v104_v38 = vrot.slane %v64_v24, %v47_v10  ;;  %v76_v42 = vrot.slane %v42_v9, %v59_v13  ;;  %v108_v43 = vrot.slane %v68_v25, %v47_v10  ;;  %v36_v45 = vunpack.c.l.bf16 %v22_v32 }
   0xa   :  { %v117_v39 = vmul.f32 %v88_v28, %v24_v8  ;;  %v118_v40 = vmul.f32 %v92_v29, %v25_v15  ;;  %v119_v41 = vmul.f32 %v96_v30, %v26_v16  ;;  %v120_v44 = vmul.f32 %v100_v31, %v27_v17  ;;  %v167_v16 = vld [vmem:[#allocation2] ss:$0 sm:$0xff] }
   0xb   :  { %v125_v48 = vmul.f32 %v88_v28, %v32_v18  ;;  %v126_v49 = vmul.f32 %v92_v29, %v33_v26  ;;  %v127_v50 = vmul.f32 %v96_v30, %v34_v27  ;;  %v30_v51 = vunpack.c.l.bf16 %v19_v37 }
   0xc   :  { %v133_v46 = vadd.f32 %v118_v40, %v117_v39  ;;  %v112_v52 = vrot.slane %v72_v35, %v47_v10  ;;  %v37_v53 = vunpack.c.h.bf16 %v22_v32  ;;  %v121_v54 = vmul.f32 %v104_v38, %v28_v33 }
   0xd   :  { %v128_v56 = vmul.f32 %v100_v31, %v35_v36  ;;  %v142_v57 = vadd.f32 %v126_v49, %v125_v48  ;;  %v31_v58 = vunpack.c.h.bf16 %v19_v37  ;;  %v116_v59 = vrot.slane %v76_v42, %v47_v10 }
   0xe   :  { %v134_v55 = vadd.f32 %v133_v46, %v119_v41  ;;  %v38_v60 = vunpack.c.l.bf16 %v23_v47  ;;  %v122_v61 = vmul.f32 %v108_v43, %v29_v34  ;;  %v129_v63 = vmul.f32 %v104_v38, %v36_v45 }
   0xf   :  { %v143_v0 = vadd.f32 %v142_v57, %v127_v50  ;;  %v39_v1 = vunpack.c.h.bf16 %v23_v47  ;;  %v123_v2 = vmul.f32 %v112_v52, %v30_v51  ;;  %v130_v4 = vmul.f32 %v108_v43, %v37_v53 }
  0x10   :  { %v135_v62 = vadd.f32 %v134_v55, %v120_v44  ;;  %v124_v6 = vmul.f32 %v116_v59, %v31_v58  ;;  %v131_v8 = vmul.f32 %v112_v52, %v38_v60 }
  0x11   :  { %v144_v5 = vadd.f32 %v143_v0, %v128_v56  ;;  %v132_v12 = vmul.f32 %v116_v59, %v39_v1 }
  0x12   :  { %v136_v3 = vadd.f32 %v135_v62, %v121_v54 }
  0x13   :  { %v145_v9 = vadd.f32 %v144_v5, %v129_v63 }
  0x14   :  { %v137_v7 = vadd.f32 %v136_v3, %v122_v61 }
  0x15   :  { %v146_v13 = vadd.f32 %v145_v9, %v130_v4 }
  0x16   :  { %v138_v11 = vadd.f32 %v137_v7, %v123_v2 }
  0x17   :  { %v147_v15 = vadd.f32 %v146_v13, %v131_v8 }
  0x18   :  { %v139_v14 = vadd.f32 %v138_v11, %v124_v6 }
  0x19   :  { %v148_v10 = vadd.f32 %v147_v15, %v132_v12 }
  0x1a   :  { %140 = vadd.xlane.f32.xlu0 %v139_v14 }
  0x1e   :  { %149 = vadd.xlane.f32.xlu0 %v148_v10 }
  0xa7   :  { %v141_v17 = vpop.xlane.xlu0 %140 }
  0xa8   :  { %v158_v18 = vadd.f32 %v167_v16, %v141_v17 }
  0xaa   :  { %161 = vst.msk [vmem:[%s227_s3] sm:$0xff] %vm160_vm0, %v158_v18 }
  0xab   :  { %v150_v19 = vpop.xlane.xlu0 %149 }
  0xac   :  { %v159_v20 = vadd.f32 %v167_v16, %v150_v19 }
  0xae   :  { %162 = vst.msk [vmem:[%s227_s3 + $0x8] sm:$0xff] %vm160_vm0, %v159_v20 }

</bundles_post_ra>
